<compile_context>
chip_gen: v5e
topology: v5e:2x2
jax: 0.10.0
libtpu: 0.0.40
codegen_flags: <defaults>
</compile_context>

<pallas_src>
import jax
import jax.numpy as jnp
from jax.experimental import pallas as pl
from jax.experimental.pallas import tpu as pltpu

NEG_SLOPE = 0.01  # nn.LeakyReLU default negative_slope

LANE = 128      # lane width  (last-dim granularity)
SUBLANE = 8     # sublane width (second-to-last dim granularity)


def _round_up(x, m):
    return ((x + m - 1) // m) * m


def fused_feature_mapper_kernel(x_ref, w_ref, b_ref, o_ref):
    # x: (TM, IN_P) bf16, w: (IN_P, TN) bf16 (pre-transposed), b: (1, TN) f32.
    # bf16 MXU matmul with f32 accumulation; epilogue stays in f32 until the
    # final cast at the store (lane-dense, unmasked vst).
    y = jnp.dot(x_ref[...], w_ref[...], preferred_element_type=jnp.float32)
    y = y + b_ref[...]
    y = jnp.maximum(y, NEG_SLOPE * y)           # leaky_relu, single vmax
    o_ref[...] = y.astype(o_ref.dtype)


def prepare_feature_mapper_params(weight, bias):
    """Convert PyTorch nn.Linear params once at init time.

    weight: (out_dim, in_dim)  -> returns (in_dim, out_dim) bf16 (MXU-natural)
    bias:   (out_dim,)         -> returns (out_dim,) f32
    Doing the transpose + bf16 cast here (not per forward) removes a ~2.4 MB
    HBM relayout from every call.
    """
    return weight.T.astype(jnp.bfloat16), bias.astype(jnp.float32)


def fused_feature_mapper(xs, weights_t, biases, *, tm_max=1024,
                         vmem_limit_bytes=32 * 1024 * 1024):
    """y_s = leaky_relu(x_s @ W_s + b_s) for several token streams, one launch.

    xs:        list of arrays, each (..., in_dim), same in_dim for all streams
    weights_t: list of pre-transposed (in_dim, out_dim) weights (bf16)
    biases:    list of (out_dim,) biases (f32)
    Returns a list of outputs with the leading shapes of each input.
    """
    num_streams = len(xs)
    assert num_streams >= 1 and num_streams == len(weights_t) == len(biases)
    in_dim = xs[0].shape[-1]
    out_dim = weights_t[0].shape[-1]
    out_dtype = xs[0].dtype
    for x in xs:
        assert x.shape[-1] == in_dim
    for w in weights_t:
        assert w.shape == (in_dim, out_dim)

    # Flatten each stream's leading dims into a token axis M.
    ms = []
    for x in xs:
        m = 1
        for d in x.shape[:-1]:
            m *= d
        ms.append(m)
    m_max = max(ms)

    # Pad feature dims to lane multiples and tokens to a common tile multiple.
    # Zero-padded K columns contribute exactly 0; padded M rows / N cols are
    # sliced off after the call.
    in_p = _round_up(in_dim, LANE)
    out_p = _round_up(out_dim, LANE)
    m_min = _round_up(max(m_max, 1), SUBLANE)
    tm = min(tm_max, m_min)                 # both are multiples of 8
    m_p = _round_up(m_min, tm)

    # Split the output dim when the halves stay lane multiples (768 -> 2x384):
    # on v7x this lets each TensorCore stream half of the weight instead of
    # idling on an empty M grid at DETRVAE token counts.
    tn = out_p // 2 if (out_p % (2 * LANE) == 0 and out_p >= 2 * LANE) else out_p

    # Stack + pad. Activations and weights go to bf16 for the MXU; the f32
    # accumulation happens inside the kernel.
    x_stk = jnp.stack([
        jnp.pad(xs[i].reshape(ms[i], in_dim).astype(jnp.bfloat16),
                ((0, m_p - ms[i]), (0, in_p - in_dim)))
        for i in range(num_streams)])
    w_stk = jnp.stack([
        jnp.pad(weights_t[i].astype(jnp.bfloat16),
                ((0, in_p - in_dim), (0, out_p - out_dim)))
        for i in range(num_streams)])
    b_stk = jnp.stack([
        jnp.pad(biases[i].astype(jnp.float32).reshape(1, out_dim),
                ((0, 0), (0, out_p - out_dim)))
        for i in range(num_streams)])

    grid = (num_streams, m_p // tm, out_p // tn)

    y_p = pl.pallas_call(
        fused_feature_mapper_kernel,
        out_shape=jax.ShapeDtypeStruct((num_streams, m_p, out_p), out_dtype),
        grid_spec=pltpu.PrefetchScalarGridSpec(
            num_scalar_prefetch=0,
            grid=grid,
            in_specs=[
                # Activation stream: tiled over (stream, M), double-buffered.
                pl.BlockSpec((None, tm, in_p), lambda s, i, j: (s, i, 0)),
                # Per-stream weight tile (in_p, tn). Default 2-deep buffering
                # is intentional: the next stream's / next N-tile's weight DMA
                # prefetches behind the current matmul.
                pl.BlockSpec((None, in_p, tn), lambda s, i, j: (s, 0, j)),
                pl.BlockSpec((None, 1, tn), lambda s, i, j: (s, 0, j)),
            ],
            out_specs=pl.BlockSpec((None, tm, tn), lambda s, i, j: (s, i, j)),
        ),
        compiler_params=pltpu.CompilerParams(
            # All grid axes are independent output tiles -> shardable across
            # both TensorCores on v7x (N-split gives each TC half the weight).
            dimension_semantics=("parallel", "parallel", "parallel"),
            # Safe on v7x's 64 MiB physical VMEM; bf16 tiles leave ample
            # headroom even at tm_max=1024.
            vmem_limit_bytes=vmem_limit_bytes,
        ),
    )(x_stk, w_stk, b_stk)

    outs = []
    for i in range(num_streams):
        y = y_p[i, :ms[i], :out_dim]
        outs.append(y.reshape(*xs[i].shape[:-1], out_dim))
    return outs


def feature_mapper(x, weight, bias, **kwargs):
    """Single-stream convenience wrapper taking PyTorch-layout params."""
    w_t, b = prepare_feature_mapper_params(weight, bias)
    return fused_feature_mapper([x], [w_t], [b], **kwargs)[0]


def feature_mapper_ref(x, weight_t, bias):
    # Reference with the same bf16 input rounding as the kernel, f32 accum.
    xb = x.astype(jnp.bfloat16).astype(jnp.float32)
    wb = weight_t.astype(jnp.bfloat16).astype(jnp.float32)
    y = jnp.einsum("...i,io->...o", xb, wb,
                   precision=jax.lax.Precision.HIGHEST) + bias.astype(jnp.float32)
    return jnp.maximum(y, NEG_SLOPE * y)


if __name__ == "__main__":
    # Shapes implied by DETRVAE's forward: two 768->768 FeatureMappers applied
    # to (batch, seq, 768) token streams. Small token counts for the test.
    D = 768
    BS = 2
    TEXT_LEN = 8      # tokenized instruction length
    VIS_TOKENS = 16   # concatenated ViT camera tokens

    key = jax.random.PRNGKey(0)
    k_t, k_v, k_tw, k_tb, k_vw, k_vb = jax.random.split(key, 6)

    bound = 1.0 / jnp.sqrt(jnp.float32(D))
    text_feats = jax.random.normal(k_t, (BS, TEXT_LEN, D), dtype=jnp.float32)
    vis_feats = jax.random.normal(k_v, (BS, VIS_TOKENS, D), dtype=jnp.float32)

    # nn.Linear-style uniform(-1/sqrt(fan_in), 1/sqrt(fan_in)) init, in the
    # original PyTorch (out_dim, in_dim) layout.
    text_w = jax.random.uniform(k_tw, (D, D), jnp.float32, -bound, bound)
    text_b = jax.random.uniform(k_tb, (D,), jnp.float32, -bound, bound)
    vis_w = jax.random.uniform(k_vw, (D, D), jnp.float32, -bound, bound)
    vis_b = jax.random.uniform(k_vb, (D,), jnp.float32, -bound, bound)

    # One-time parameter preparation (transpose + bf16), like storing the
    # weights in the kernel-friendly layout.
    text_wt, text_bp = prepare_feature_mapper_params(text_w, text_b)
    vis_wt, vis_bp = prepare_feature_mapper_params(vis_w, vis_b)

    # Fused text_featuremapper + visual_featuremapper forward pass (one launch).
    text_out, vis_out = fused_feature_mapper(
        [text_feats, vis_feats], [text_wt, vis_wt], [text_bp, vis_bp])
    jax.block_until_ready((text_out, vis_out))

    text_ref = feature_mapper_ref(text_feats, text_wt, text_bp)
    vis_ref = feature_mapper_ref(vis_feats, vis_wt, vis_bp)

    assert text_out.shape == (BS, TEXT_LEN, D)
    assert vis_out.shape == (BS, VIS_TOKENS, D)
    assert jnp.allclose(text_out, text_ref, atol=2e-3, rtol=2e-3), \
        "text_featuremapper mismatch vs reference"
    assert jnp.allclose(vis_out, vis_ref, atol=2e-3, rtol=2e-3), \
        "visual_featuremapper mismatch vs reference"

    print("KERNEL_OK")
</pallas_src>

<mosaic_0001>
module attributes {stable_mosaic.version = 11 : i64} {
  func.func @fused_feature_mapper_kernel(%arg0: i32, %arg1: i32, %arg2: i32, %arg3: memref<1x32x768xbf16, #tpu.memory_space<vmem>>, %arg4: memref<1x768x384xbf16, #tpu.memory_space<vmem>>, %arg5: memref<1x1x384xf32, #tpu.memory_space<vmem>>, %arg6: memref<1x32x384xf32, #tpu.memory_space<vmem>>) attributes {dimension_semantics = [#tpu.dimension_semantics<parallel>, #tpu.dimension_semantics<parallel>, #tpu.dimension_semantics<parallel>], iteration_bounds = array<i64: 2, 1, 2>, scalar_prefetch = 0 : i64, scratch_operands = 0 : i64, tpu.core_type = #tpu.core_type<tc>, window_params = [{transform_indices = @transform_0, window_bounds = array<i64: 1, 32, 768>}, {transform_indices = @transform_1, window_bounds = array<i64: 1, 768, 384>}, {transform_indices = @transform_2, window_bounds = array<i64: 1, 1, 384>}, {transform_indices = @transform_3, window_bounds = array<i64: 1, 32, 384>}]} {
    %c0 = arith.constant 0 : index
    %c0_0 = arith.constant 0 : index
    %c0_1 = arith.constant 0 : index
    %0 = vector.load %arg3[%c0, %c0_0, %c0_1] : memref<1x32x768xbf16, #tpu.memory_space<vmem>>, vector<1x32x768xbf16>
    %1 = vector.shape_cast %0 : vector<1x32x768xbf16> to vector<32x768xbf16>
    %c0_2 = arith.constant 0 : index
    %c0_3 = arith.constant 0 : index
    %c0_4 = arith.constant 0 : index
    %2 = vector.load %arg4[%c0_2, %c0_3, %c0_4] : memref<1x768x384xbf16, #tpu.memory_space<vmem>>, vector<1x768x384xbf16>
    %3 = vector.shape_cast %2 : vector<1x768x384xbf16> to vector<768x384xbf16>
    %cst = arith.constant dense<0.000000e+00> : vector<32x384xf32>
    %4 = tpu.matmul %1, %3, %cst {dimension_numbers = #tpu.dot_dimension_numbers<[1], [0], [0], [1], [0, 0, 1, 1], [], []>} : vector<32x768xbf16>, vector<768x384xbf16>, vector<32x384xf32> -> vector<32x384xf32>
    %c0_5 = arith.constant 0 : index
    %c0_6 = arith.constant 0 : index
    %c0_7 = arith.constant 0 : index
    %5 = vector.load %arg5[%c0_5, %c0_6, %c0_7] : memref<1x1x384xf32, #tpu.memory_space<vmem>>, vector<1x1x384xf32>
    %6 = vector.shape_cast %5 : vector<1x1x384xf32> to vector<1x384xf32>
    %7 = vector.broadcast %6 : vector<1x384xf32> to vector<32x384xf32>
    %8 = arith.addf %4, %7 : vector<32x384xf32>
    %cst_8 = arith.constant 0.00999999977 : f32
    %9 = vector.broadcast %cst_8 : f32 to vector<32x384xf32>
    %10 = arith.mulf %9, %8 : vector<32x384xf32>
    %11 = arith.maximumf %8, %10 : vector<32x384xf32>
    %c0_9 = arith.constant 0 : index
    %c0_10 = arith.constant 0 : index
    %c0_11 = arith.constant 0 : index
    %12 = vector.load %arg6[%c0_9, %c0_10, %c0_11] : memref<1x32x384xf32, #tpu.memory_space<vmem>>, vector<1x32x384xf32>
    %13 = vector.shape_cast %12 : vector<1x32x384xf32> to vector<32x384xf32>
    %14 = vector.shape_cast %11 : vector<32x384xf32> to vector<1x32x384xf32>
    tpu.vector_store %arg6[%c0_9, %c0_10, %c0_11], %14 {strides = array<i32>} : memref<1x32x384xf32, #tpu.memory_space<vmem>>, vector<1x32x384xf32>,
    return
  }
  func.func @transform_0(%arg0: i32, %arg1: i32, %arg2: i32) -> (i32, i32, i32) {
    %c0_i32 = arith.constant 0 : i32
    %c0_i32_0 = arith.constant 0 : i32
    return %arg0, %arg1, %c0_i32 : i32, i32, i32
  }
  func.func @transform_1(%arg0: i32, %arg1: i32, %arg2: i32) -> (i32, i32, i32) {
    %c0_i32 = arith.constant 0 : i32
    %c0_i32_0 = arith.constant 0 : i32
    return %arg0, %c0_i32, %arg2 : i32, i32, i32
  }
  func.func @transform_2(%arg0: i32, %arg1: i32, %arg2: i32) -> (i32, i32, i32) {
    %c0_i32 = arith.constant 0 : i32
    %c0_i32_0 = arith.constant 0 : i32
    return %arg0, %c0_i32, %arg2 : i32, i32, i32
  }
  func.func @transform_3(%arg0: i32, %arg1: i32, %arg2: i32) -> (i32, i32, i32) {
    %c0_i32 = arith.constant 0 : i32
    return %arg0, %arg1, %arg2 : i32, i32, i32
  }
}

</mosaic_0001>

<bundles_post_ra>
// kernel: tpu_custom_call.1
= control target key start
LH: loop header
LB: loop body
LE: loop exit
PB: predicated region body
PF: predicated region fallthrough
CT: control target
= control target key end

     0   :  { %s3715_s0 = inlined_call_operand.hbm [shape: bf16[2,32,768], index: 0, kind: input, shape index: {}]   ;;  %s3716_s1 = inlined_call_operand.hbm [shape: bf16[2,768,768], index: 1, kind: input, shape index: {}]   ;;  %s3717_s2 = inlined_call_operand.hbm [shape: f32[2,1,768], index: 2, kind: input, shape index: {}]   ;;  %s3718_s3 = inlined_call_operand.hbm [shape: f32[2,32,768], index: 3, kind: output, shape index: {}]  }
   0x1   :  { %3733 = sst [smem:[#allocation23_spill]] %s3716_s1 }
   0x2   :  { %3734 = sst [smem:[#allocation24_spill]] %s3718_s3 }
   0x3   :  { %8 = vsyncpa [#allocation3], 0 }
   0x4   :  { %10 = vsyncpa [#allocation3 + $0x1], 0 }
   0x5   :  { %11 = vsyncpa [#allocation6], 0 }
   0x6   :  { %13 = vsyncpa [#allocation6 + $0x1], 0 }
   0x7   :  { %14 = vsyncpa [#allocation4], 0 }
   0x8   :  { %16 = vsyncpa [#allocation4 + $0x1], 0  ;;  %s3073_s12 = smov 0   ;;  %s3075_s13 = smov 0  }
   0x9   :  { %s3077_s14 = smov 0   ;;  %s3079_s15 = smov 0  }
   0xa   :  { %s3081_s16 = smov 0   ;;  %s3083_s17 = smov 0  }
   0xb   :  { %s3085_s18 = smov 0   ;;  %s3087_s19 = smov 0  }
   0xc   :  { %s3089_s20 = smov 0   ;;  %s3091_s21 = smov 0  }
   0xd   :  { %s3093_s22 = smov 0  }
   0xe LB: > { %3735 = sst [smem:[#allocation12_spill]] %s3004_s12  ;;  %s3129_s23 = sadd.s32 4294967295, %s3044_s22   ;;  %s3044_s22 = sphi %s3093_s22, %s22_s22   ;;  %s3040_s21 = sphi %s3091_s21, %s3779_s21   ;;  %s3036_s20 = sphi %s3089_s20, %s3778_s20   ;;  %s3032_s19 = sphi %s3087_s19, %s3777_s19   ;;  %s3028_s18 = sphi %s3085_s18, %s3776_s18   ;;  %s3024_s17 = sphi %s3083_s17, %s3768_s17   ;;  %s3020_s16 = sphi %s3081_s16, %s3775_s16   ;;  %s3016_s15 = sphi %s3079_s15, %s3774_s15   ;;  %s3012_s14 = sphi %s3077_s14, %s3773_s14   ;;  %s3008_s13 = sphi %s3075_s13, %s3772_s13   ;;  %s3004_s12 = sphi %s3073_s12, %s3771_s12  }
   0xf   : > { %3736 = sst [smem:[#allocation13_spill]] %s3024_s17  ;;  %s1893_s24 = sadd.s32 4294967294, %s3044_s22  }
  0x10   : > { %3737 = sst [smem:[#allocation14_spill]] %s3028_s18  ;;  %s34_s25 = sadd.s32 1, %s3036_s20 }
  0x11   : > { %3738 = sst [smem:[#allocation15_spill]] %s3032_s19  ;;  %s41_s26 = sadd.s32 1, %s3040_s21 }
  0x12   : > { %3739 = sst [smem:[#allocation16_spill]] %s3044_s22  ;;  %p35_p0 = scmp.ge.s32.totalorder %s34_s25, 2 }
  0x13   : > { %p58_p1 = scmp.eq.s32.totalorder %s3044_s22, 0  ;;  %s78_s27 = sadd.s32 1, %s3012_s14 }
  0x14   : > { %p85_p2 = scmp.ne.s32.totalorder %s3012_s14, %s3008_s13  ;;  %s3781_s25 = smov (%p35_p0, %s34_s25), 0 }
  0x15   : > { %3740 = sst [smem:[#allocation17_spill]] %s3781_s25  ;;  %s3783_s26 = smov (!%p35_p0, %s41_s26), %s3040_s21 }
  0x16   : > { %s74_s28 = ssub.s32 %s3036_s20, %s3781_s25  ;;  %p3145_p3 = por %p85_p2, %p58_p1 }
  0x17   : > { %p43_p4 = scmp.ge.s32.totalorder %s3783_s26, 2  ;;  %p91_p5 = scmp.ne.s32.totalorder %s3008_s13, %s3004_s12 }
  0x18   : > { %p147_p6 = scmp.eq.s32.totalorder %s3129_s23, 3  ;;  %p153_p7 = scmp.eq.s32.totalorder %s1893_s24, 3 }
  0x19   : > { %s3785_s26 = smov (%p43_p4, %s3783_s26), 0  ;;  %p3723_p10 = scmp.lt.s32.totalorder %s3044_s22, 4 }
  0x1a   : > { %3742 = sst [smem:[#allocation18_spill]] %s3785_s26  ;;  %p3154_p8 = por %p147_p6, %p85_p2 }
  0x1b   : > { %p3161_p9 = por %p153_p7, %p91_p5  ;;  %s3167_s5 = ssub.s32 %s3040_s21, %s3785_s26 }
  0x1c   : > { %s3743_s30 = scalar_select %p3154_p8, 1, 0 }
  0x1d   : > { %s3745_s4 = scalar_select %p3161_p9, 1, 0 }
  0x1e   : > { %3744 = sst [smem:[#allocation19_spill]] %s3743_s30  ;;  %s75_s6 = sor.u32 %s74_s28, %s3167_s5 }
  0x1f   : > { %3746 = sst [smem:[#allocation20_spill]] %s3745_s4  ;;  %p76_p11 = scmp.eq.s32.totalorder %s75_s6, 0 }
  0x20   : > { %s198_s7 = sand.u32 1, %s3044_s22   ;;  %s3721_s8 = sand.u32 1, %s3012_s14  }
  0x21   : > { %s3174_s9 = scalar_select %p76_p11, %s3012_s14, %s78_s27  }
  0x22   : > { %s2700_s10 = smul.u32 1152, %s3721_s8  ;;  %p3183_p12 = pnand %p3723_p10, %p3145_p3 }
  0x23   : > { %3747 = sst [smem:[#allocation21_spill]] %s3174_s9  ;;  %s3724_s11 = smul.u32 3, %s3036_s20 }
  0x24   : > { %s2701_s26 = smul.u32 576, %s3040_s21  ;;  %s202_s28 = scalar_lea.vmem [#allocation5], %s2700_s10 }
  0x25   : > { %s212_s25 = sshll.u32 %s202_s28, 4  ;;  %s3749_s1 = sld [smem:[#allocation23_spill]]  ;;  %s213_s25 = int_to_ptr.vmem [resolvable:$true] %s212_s25 }
  0x26   : > { %s207_s6 = sadd.s32 %s2701_s26, %s3724_s11  ;;  %p1898_p13 = scmp.ge.s32.totalorder %s3044_s22, 1 }
  0x27   : > { %s1897_s27 = sshll.u32 %s207_s6, 2  ;;  %p241_p0 = scmp.lt.s32.totalorder %s3044_s22, 5 }
  0x28   : > { %s3195_s10 = scalar_lea.sflag [#allocation6], %s198_s7  ;;  %s3725_s26 = smov 384  }
  0x29   : > { %s3047_s28 = smov 192   ;;  %s3048_s6 = smov 12  }
  0x2a   : > { %p3201_p2 = pnand %p1898_p13, %p241_p0  ;;  %p48_p3 = scmp.eq.s32.totalorder %s3167_s5, 0 }
  0x2b   : > { %s209_s9 = scalar_lea.hbm %s3749_s1, %s1897_s27  ;;  %p57_p4 = scmp.ne.s32.totalorder %s3024_s17, %s3020_s16 }
  0x2c   : > { %s210_s4 = sshll.u32 %s209_s9, 4  ;;  %s50_s9 = sadd.s32 1, %s3024_s17  ;;  %s211_s4 = int_to_ptr.hbm [resolvable:$true] %s210_s4 }
  0x2d   : > { %2723 = dma.hbm_to_vmem [thread:$0]  (!%p3183_p12), %s211_s4, 18432, %s213_s25, %s3195_s10, %s3725_s26, %s3047_s28, %s3048_s6  }
  0x2e   : > { %s3210_s7 = scalar_select %p48_p3, %s3024_s17, %s50_s9  }
  0x2f   : > { %p59_p6 = por %p58_p1, %p57_p4  ;;  %p63_p7 = scmp.ne.s32.totalorder %s3020_s16, %s3016_s15 }
  0x30   : > { %3751 = sst [smem:[#allocation22_spill]] %s3210_s7  ;;  %p64_p11 = scmp.eq.s32.totalorder %s3129_s23, 0 }
  0x31   : > { %s173_s27 = sand.u32 1, %s3024_s17   ;;  %s2699_s5 = smul.u32 96, %s3040_s21 }
  0x32   : > { %s2698_s29 = smul.u32 96, %s173_s27  ;;  %p3218_p10 = por %p64_p11, %p63_p7 }
  0x33   : > { %p3225_p13 = por %p91_p5, %p64_p11  ;;  %p3754_p1 = scmp.lt.s32.totalorder %s3044_s22, 4 }
  0x34   : > { %s177_s28 = scalar_lea.vmem [#allocation2], %s2698_s29  ;;  %s185_s11 = scalar_lea.hbm %s3715_s0, %s2699_s5 }
  0x35   : > { %s188_s6 = sshll.u32 %s177_s28, 4  ;;  %p2718_p0 = pnand %p3754_p1, %p59_p6  ;;  %s189_s6 = int_to_ptr.vmem [resolvable:$true] %s188_s6 }
  0x36   : > { %s186_s26 = sshll.u32 %s185_s11, 4  ;;  %s174_s1 = scalar_lea.sflag [#allocation3], %s173_s27  ;;  %s187_s26 = int_to_ptr.hbm [resolvable:$true] %s186_s26 }
  0x37   : > { %s3049_s7 = smov 24   ;;  %s3755_s17 = smov 384  }
  0x38   : > { %2720 = dma.hbm_to_vmem [thread:$0]  (!%p2718_p0), %s187_s26, 1536, %s189_s6, %s174_s1, %s3755_s17, %s3755_s17, %s3049_s7  }
  0x39   : > { %s3756_s12 = sand.u32 1, %s3012_s14   ;;  %s2703_s29 = smul.u32 6, %s3040_s21 }
  0x3a   : > { %s2702_s30 = smul.u32 3, %s3756_s12  ;;  %s247_s1 = sand.u32 (!%p3201_p2), 1, %s3020_s16  }
  0x3b   : > { %s3757_s28 = smul.u32 3, %s3036_s20  ;;  %s248_s17 = scalar_lea.sflag (!%p3201_p2), [#allocation3], %s247_s1 }
  0x3c   : > { %s226_s3 = scalar_lea.vmem [#allocation7], %s2702_s30  ;;  %245 = sbr.rel (%p3201_p2) target bundleno = 389 (0x185), region = 32 }
  0x3d   : > { %s231_s22 = sadd.s32 %s2703_s29, %s3757_s28  ;;  %s236_s19 = sshll.u32 %s226_s3, 4  ;;  %s237_s19 = int_to_ptr.vmem [resolvable:$true] %s236_s19 }
  0x3e   : > { %s232_s5 = scalar_lea.hbm %s3717_s2, %s231_s22  ;;  %s2704_s12 = smul.u32 (!%p3201_p2), 96, %s247_s1 }
  0x3f   : > { %s234_s9 = sshll.u32 %s232_s5, 4  ;;  %s235_s9 = int_to_ptr.hbm [resolvable:$true] %s234_s9 }
  0x40   : > { %2726 = dma.hbm_to_vmem [thread:$0]  (!%p3183_p12), %s235_s9, 48, %s237_s19, %s3195_s10  }
  0x41   : > { %s3251_s11 = scalar_lea.vmem [#allocation2], %s2704_s12 }
  0x42   : > { %2991 = dma.done.wait (%p3218_p10), %s248_s17, 1536  }
  0x43   : > { %2993 = vsyncadd (%p3218_p10), %s248_s17, 4294965760  ;;  %s257_s3 = sand.u32 1, %s3129_s23   ;;  %s3259_s18 = sand.u32 1, %s3008_s13  }
  0x44   : > { %s2705_s19 = smul.u32 1152, %s3259_s18  ;;  %s258_s22 = scalar_lea.sflag [#allocation6], %s257_s3 }
  0x46   : > { %s3262_s30 = scalar_lea.vmem [#allocation5], %s2705_s19 }
  0x47   : > { %2995 = dma.done.wait (%p3225_p13), %s258_s22, 18480  }
  0x48   : > { %2997 = vsyncadd (%p3225_p13), %s258_s22, 4294948816  ;;  %v2033_v0 = vld [vmem:[%s3262_s30 + $0xa8] sm:$0xf]  ;;  %v2560_v1 = vld [vmem:[%s3262_s30 + $0xb0] sm:$0xf0]  ;;  %s2706_s23 = smul.u32 3, %s3259_s18 }
  0x49   : > { %v2129_v2 = vld [vmem:[%s3262_s30 + $0x168] sm:$0xf]  ;;  %v2034_v3 = vor.u32 %v2560_v1, %v2033_v0  ;;  %v2584_v4 = vld [vmem:[%s3262_s30 + $0x170] sm:$0xf0]  ;;  %v2021_v11 = vld [vmem:[%s3262_s30 + $0x90] sm:$0xf] }
  0x4a   : > { %v2225_v5 = vld [vmem:[%s3262_s30 + $0x228] sm:$0xf]  ;;  %v2608_v6 = vld [vmem:[%s3262_s30 + $0x230] sm:$0xf0]  ;;  %v2130_v7 = vor.u32 %v2584_v4, %v2129_v2  ;;  %v2557_v13 = vld [vmem:[%s3262_s30 + $0x98] sm:$0xf0] }
  0x4b   : > { %v2226_v8 = vor.u32 %v2608_v6, %v2225_v5  ;;  %v2321_v9 = vld [vmem:[%s3262_s30 + $0x2e8] sm:$0xf]  ;;  %v2632_v10 = vld [vmem:[%s3262_s30 + $0x2f0] sm:$0xf0]  ;;  %1350 = vmatpush.bf16.msra.mxu0 %v2034_v3  ;;  %v2117_v14 = vld [vmem:[%s3262_s30 + $0x150] sm:$0xf]  ;;  %v2022_v16 = vor.u32 %v2557_v13, %v2021_v11 }
  0x4c   : > { %v2322_v12 = vor.u32 %v2632_v10, %v2321_v9  ;;  %v2581_v15 = vld [vmem:[%s3262_s30 + $0x158] sm:$0xf0]  ;;  %1369 = vmatpush.bf16.msra.mxu1 %v2130_v7  ;;  %v2213_v18 = vld [vmem:[%s3262_s30 + $0x210] sm:$0xf]  ;;  %v2009_v23 = vld [vmem:[%s3262_s30 + $0x78] sm:$0xf] }
  0x4d   : > { %1388 = vmatpush.bf16.msra.mxu2 %v2226_v8  ;;  %v2118_v17 = vor.u32 %v2581_v15, %v2117_v14  ;;  %v2605_v19 = vld [vmem:[%s3262_s30 + $0x218] sm:$0xf0]  ;;  %v2309_v20 = vld [vmem:[%s3262_s30 + $0x2d0] sm:$0xf]  ;;  %v2554_v24 = vld [vmem:[%s3262_s30 + $0x80] sm:$0xf0] }
  0x4e   : > { %1407 = vmatpush.bf16.msra.mxu3 %v2322_v12  ;;  %v2214_v21 = vor.u32 %v2605_v19, %v2213_v18  ;;  %v2629_v22 = vld [vmem:[%s3262_s30 + $0x2d8] sm:$0xf0]  ;;  %v2105_v26 = vld [vmem:[%s3262_s30 + $0x138] sm:$0xf]  ;;  %v2578_v27 = vld [vmem:[%s3262_s30 + $0x140] sm:$0xf0]  ;;  %v2010_v29 = vor.u32 %v2554_v24, %v2009_v23 }
  0x4f   : > { %v2310_v25 = vor.u32 %v2629_v22, %v2309_v20  ;;  %v2201_v28 = vld [vmem:[%s3262_s30 + $0x1f8] sm:$0xf]  ;;  %1351 = vmatpush.bf16.msra.mxu0 %v2022_v16  ;;  %v2602_v30 = vld [vmem:[%s3262_s30 + $0x200] sm:$0xf0]  ;;  %v2106_v33 = vor.u32 %v2578_v27, %v2105_v26  ;;  %v1997_v35 = vld [vmem:[%s3262_s30 + $0x60] sm:$0xf] }
  0x50   : > { %v2297_v31 = vld [vmem:[%s3262_s30 + $0x2b8] sm:$0xf]  ;;  %v2626_v32 = vld [vmem:[%s3262_s30 + $0x2c0] sm:$0xf0]  ;;  %1370 = vmatpush.bf16.msra.mxu1 %v2118_v17  ;;  %v2202_v34 = vor.u32 %v2602_v30, %v2201_v28  ;;  %v2551_v36 = vld [vmem:[%s3262_s30 + $0x68] sm:$0xf0] }
  0x51   : > { %1389 = vmatpush.bf16.msra.mxu2 %v2214_v21  ;;  %v2093_v37 = vld [vmem:[%s3262_s30 + $0x120] sm:$0xf]  ;;  %v2298_v38 = vor.u32 %v2626_v32, %v2297_v31  ;;  %v2575_v39 = vld [vmem:[%s3262_s30 + $0x128] sm:$0xf0]  ;;  %v1998_v44 = vor.u32 %v2551_v36, %v1997_v35  ;;  %v1985_v47 = vld [vmem:[%s3262_s30 + $0x48] sm:$0xf] }
  0x52   : > { %1408 = vmatpush.bf16.msra.mxu3 %v2310_v25  ;;  %v2189_v40 = vld [vmem:[%s3262_s30 + $0x1e0] sm:$0xf]  ;;  %v2599_v41 = vld [vmem:[%s3262_s30 + $0x1e8] sm:$0xf0]  ;;  %v2094_v45 = vor.u32 %v2575_v39, %v2093_v37  ;;  %v2548_v48 = vld [vmem:[%s3262_s30 + $0x50] sm:$0xf0] }
  0x53   : > { %v2285_v42 = vld [vmem:[%s3262_s30 + $0x2a0] sm:$0xf]  ;;  %v2623_v43 = vld [vmem:[%s3262_s30 + $0x2a8] sm:$0xf0]  ;;  %1352 = vmatpush.bf16.msra.mxu0 %v2010_v29  ;;  %v2190_v46 = vor.u32 %v2599_v41, %v2189_v40  ;;  %v2081_v49 = vld [vmem:[%s3262_s30 + $0x108] sm:$0xf]  ;;  %v1986_v56 = vor.u32 %v2548_v48, %v1985_v47 }
  0x54   : > { %1371 = vmatpush.bf16.msra.mxu1 %v2106_v33  ;;  %v2286_v50 = vor.u32 %v2623_v43, %v2285_v42  ;;  %v2572_v51 = vld [vmem:[%s3262_s30 + $0x110] sm:$0xf0]  ;;  %v2177_v52 = vld [vmem:[%s3262_s30 + $0x1c8] sm:$0xf]  ;;  %v1973_v59 = vld [vmem:[%s3262_s30 + $0x30] sm:$0xf] }
  0x55   : > { %1390 = vmatpush.bf16.msra.mxu2 %v2202_v34  ;;  %v2596_v53 = vld [vmem:[%s3262_s30 + $0x1d0] sm:$0xf0]  ;;  %v2273_v54 = vld [vmem:[%s3262_s30 + $0x288] sm:$0xf]  ;;  %v2082_v57 = vor.u32 %v2572_v51, %v2081_v49  ;;  %v2545_v60 = vld [vmem:[%s3262_s30 + $0x38] sm:$0xf0] }
  0x56   : > { %1409 = vmatpush.bf16.msra.mxu3 %v2298_v38  ;;  %v2620_v55 = vld [vmem:[%s3262_s30 + $0x290] sm:$0xf0]  ;;  %v2178_v58 = vor.u32 %v2596_v53, %v2177_v52  ;;  %v2069_v61 = vld [vmem:[%s3262_s30 + $0xf0] sm:$0xf]  ;;  %v2569_v63 = vld [vmem:[%s3262_s30 + $0xf8] sm:$0xf0]  ;;  %v1974_v4 = vor.u32 %v2545_v60, %v1973_v59 }
  0x57   : > { %1353 = vmatpush.bf16.msra.mxu0 %v1998_v44  ;;  %v2274_v62 = vor.u32 %v2620_v55, %v2273_v54  ;;  %v2165_v0 = vld [vmem:[%s3262_s30 + $0x1b0] sm:$0xf]  ;;  %v2593_v1 = vld [vmem:[%s3262_s30 + $0x1b8] sm:$0xf0]  ;;  %v2070_v5 = vor.u32 %v2569_v63, %v2069_v61  ;;  %v1961_v7 = vld [vmem:[%s3262_s30 + $0x18] sm:$0xf] }
  0x58   : > { %1372 = vmatpush.bf16.msra.mxu1 %v2094_v45  ;;  %v2261_v2 = vld [vmem:[%s3262_s30 + $0x270] sm:$0xf]  ;;  %v2617_v3 = vld [vmem:[%s3262_s30 + $0x278] sm:$0xf0]  ;;  %v2166_v6 = vor.u32 %v2593_v1, %v2165_v0  ;;  %v2542_v8 = vld [vmem:[%s3262_s30 + $0x20] sm:$0xf0] }
  0x59   : > { %1391 = vmatpush.bf16.msra.mxu2 %v2190_v46  ;;  %v2057_v9 = vld [vmem:[%s3262_s30 + $0xd8] sm:$0xf]  ;;  %v2262_v10 = vor.u32 %v2617_v3, %v2261_v2  ;;  %v2566_v11 = vld [vmem:[%s3262_s30 + $0xe0] sm:$0xf0]  ;;  %v1949_v16 = vld [vmem:[%s3262_s30] sm:$0xf]  ;;  %v1962_v17 = vor.u32 %v2542_v8, %v1961_v7 }
  0x5a   : > { %1410 = vmatpush.bf16.msra.mxu3 %v2286_v50  ;;  %v2153_v12 = vld [vmem:[%s3262_s30 + $0x198] sm:$0xf]  ;;  %v2590_v13 = vld [vmem:[%s3262_s30 + $0x1a0] sm:$0xf0]  ;;  %v2539_v18 = vld [vmem:[%s3262_s30 + $0x8] sm:$0xf0]  ;;  %v2058_v21 = vor.u32 %v2566_v11, %v2057_v9 }
  0x5b   : > { %1354 = vmatpush.bf16.msra.mxu0 %v1986_v56  ;;  %v2249_v14 = vld [vmem:[%s3262_s30 + $0x258] sm:$0xf]  ;;  %v2614_v15 = vld [vmem:[%s3262_s30 + $0x260] sm:$0xf0]  ;;  %v2045_v19 = vld [vmem:[%s3262_s30 + $0xc0] sm:$0xf]  ;;  %v2154_v22 = vor.u32 %v2590_v13, %v2153_v12  ;;  %v1950_v34 = vor.u32 %v2539_v18, %v1949_v16 }
  0x5c   : > { %1373 = vmatpush.bf16.msra.mxu1 %v2082_v57  ;;  %v2563_v20 = vld [vmem:[%s3262_s30 + $0xc8] sm:$0xf0]  ;;  %v2141_v23 = vld [vmem:[%s3262_s30 + $0x180] sm:$0xf]  ;;  %v2250_v26 = vor.u32 %v2614_v15, %v2249_v14  ;;  %v2529_v29 = vld [vmem:[%s3251_s11 + $0x14] sm:$0xf0] }
  0x5d   : > { %1392 = vmatpush.bf16.msra.mxu2 %v2178_v58  ;;  %v2587_v24 = vld [vmem:[%s3262_s30 + $0x188] sm:$0xf0]  ;;  %v2237_v25 = vld [vmem:[%s3262_s30 + $0x240] sm:$0xf]  ;;  %v2526_v30 = vld [vmem:[%s3251_s11 + $0x4] sm:$0xf]  ;;  %v2046_v38 = vor.u32 %v2563_v20, %v2045_v19 }
  0x5e   : > { %1411 = vmatpush.bf16.msra.mxu3 %v2274_v62  ;;  %v2611_v27 = vld [vmem:[%s3262_s30 + $0x248] sm:$0xf0]  ;;  %v1901_v28 = vld [vmem:[%s3251_s11] sm:$0xf]  ;;  %v1903_v31 = vld [vmem:[%s3251_s11 + $0x18] sm:$0xf0]  ;;  %v2142_v39 = vor.u32 %v2587_v24, %v2141_v23 }
  0x5f   : > { %1355 = vmatpush.bf16.msra.mxu0 %v1974_v4  ;;  %v2559_v32 = vld [vmem:[%s3262_s30 + $0xac] sm:$0xf]  ;;  %v2035_v33 = vld [vmem:[%s3262_s30 + $0xb4] sm:$0xf0]  ;;  %v1909_v35 = vld [vmem:[%s3251_s11 + $0x8] sm:$0xf]  ;;  %v2238_v43 = vor.u32 %v2611_v27, %v2237_v25  ;;  %v3347_v48 = vor.u32 %v2529_v29, %v1901_v28  ;;  %v3352_v53 = vor.u32 %v2526_v30, %v1903_v31 }
  0x60   : > { %1374 = vmatpush.bf16.msra.mxu1 %v2070_v5  ;;  %v2513_v36 = vld [vmem:[%s3262_s30 + $0x468] sm:$0xf]  ;;  %v2680_v37 = vld [vmem:[%s3262_s30 + $0x470] sm:$0xf0]  ;;  %v2530_v40 = vld [vmem:[%s3251_s11 + $0x1c] sm:$0xf0]  ;;  %v2038_v44 = vor.u32 %v2559_v32, %v2035_v33 }
  0x61   : > { %1393 = vmatpush.bf16.msra.mxu2 %v2166_v6  ;;  %v2527_v41 = vld [vmem:[%s3251_s11 + $0xc] sm:$0xf]  ;;  %v1911_v42 = vld [vmem:[%s3251_s11 + $0x20] sm:$0xf0]  ;;  %v2417_v45 = vld [vmem:[%s3262_s30 + $0x3a8] sm:$0xf]  ;;  %v2514_v49 = vor.u32 %v2680_v37, %v2513_v36  ;;  %v3354_v54 = vor.u32 %v2530_v40, %v1909_v35 }
  0x62   : > { %1412 = vmatpush.bf16.msra.mxu3 %v2262_v10  ;;  %v2656_v46 = vld [vmem:[%s3262_s30 + $0x3b0] sm:$0xf0]  ;;  %v2583_v47 = vld [vmem:[%s3262_s30 + $0x16c] sm:$0xf]  ;;  %v2131_v50 = vld [vmem:[%s3262_s30 + $0x174] sm:$0xf0]  ;;  %v3358_v57 = vor.u32 %v2527_v41, %v1911_v42 }
  0x63   : > { %1356 = vmatpush.bf16.msra.mxu0 %v1962_v17  ;;  %v2556_v51 = vld [vmem:[%s3262_s30 + $0x94] sm:$0xf]  ;;  %v2023_v52 = vld [vmem:[%s3262_s30 + $0x9c] sm:$0xf0]  ;;  %v2501_v55 = vld [vmem:[%s3262_s30 + $0x450] sm:$0xf]  ;;  %v2418_v58 = vor.u32 %v2656_v46, %v2417_v45  ;;  %v2134_v59 = vor.u32 %v2583_v47, %v2131_v50 }
  0x64   : > { %1375 = vmatpush.bf16.msra.mxu1 %v2058_v21  ;;  %v2677_v56 = vld [vmem:[%s3262_s30 + $0x458] sm:$0xf0]  ;;  %v2026_v60 = vor.u32 %v2556_v51, %v2023_v52  ;;  %v2405_v61 = vld [vmem:[%s3262_s30 + $0x390] sm:$0xf]  ;;  %v2580_v63 = vld [vmem:[%s3262_s30 + $0x154] sm:$0xf] }
  0x65   : > { %1394 = vmatpush.bf16.msra.mxu2 %v2154_v22  ;;  %v2653_v62 = vld [vmem:[%s3262_s30 + $0x398] sm:$0xf0]  ;;  %v2502_v0 = vor.u32 %v2677_v56, %v2501_v55  ;;  %v2119_v1 = vld [vmem:[%s3262_s30 + $0x15c] sm:$0xf0]  ;;  %v2011_v3 = vld [vmem:[%s3262_s30 + $0x84] sm:$0xf0] }
  0x66   : > { %1413 = vmatpush.bf16.msra.mxu3 %v2250_v26  ;;  %v2553_v2 = vld [vmem:[%s3262_s30 + $0x7c] sm:$0xf]  ;;  %v2489_v4 = vld [vmem:[%s3262_s30 + $0x438] sm:$0xf]  ;;  %v2674_v5 = vld [vmem:[%s3262_s30 + $0x440] sm:$0xf0]  ;;  %v2406_v6 = vor.u32 %v2653_v62, %v2405_v61  ;;  %v2122_v7 = vor.u32 %v2580_v63, %v2119_v1 }
  0x67   : > { %1357 = vmatpush.bf16.msra.mxu0 %v1950_v34  ;;  %v2014_v8 = vor.u32 %v2553_v2, %v2011_v3  ;;  %v2393_v9 = vld [vmem:[%s3262_s30 + $0x378] sm:$0xf]  ;;  %v2650_v10 = vld [vmem:[%s3262_s30 + $0x380] sm:$0xf0]  ;;  %v2577_v11 = vld [vmem:[%s3262_s30 + $0x13c] sm:$0xf]  ;;  %v2490_v12 = vor.u32 %v2674_v5, %v2489_v4 }
  0x68   : > { %1376 = vmatpush.bf16.msra.mxu1 %v2046_v38  ;;  %v2107_v13 = vld [vmem:[%s3262_s30 + $0x144] sm:$0xf0]  ;;  %v2550_v14 = vld [vmem:[%s3262_s30 + $0x64] sm:$0xf]  ;;  %v1999_v15 = vld [vmem:[%s3262_s30 + $0x6c] sm:$0xf0]  ;;  %v2394_v18 = vor.u32 %v2650_v10, %v2393_v9 }
  0x69   : > { %1395 = vmatpush.bf16.msra.mxu2 %v2142_v39  ;;  %v2477_v16 = vld [vmem:[%s3262_s30 + $0x420] sm:$0xf]  ;;  %v2671_v17 = vld [vmem:[%s3262_s30 + $0x428] sm:$0xf0]  ;;  %v2574_v21 = vld [vmem:[%s3262_s30 + $0x124] sm:$0xf]  ;;  %v2110_v22 = vor.u32 %v2577_v11, %v2107_v13  ;;  %v2002_v23 = vor.u32 %v2550_v14, %v1999_v15 }
  0x6a   : > { %1414 = vmatpush.bf16.msra.mxu3 %v2238_v43  ;;  %1358 = vmatmul.bf16.vlgmr.msra.gmra.mxu0 %v3347_v48  ;;  %v2381_v19 = vld [vmem:[%s3262_s30 + $0x360] sm:$0xf]  ;;  %v2647_v20 = vld [vmem:[%s3262_s30 + $0x368] sm:$0xf0]  ;;  %v2095_v24 = vld [vmem:[%s3262_s30 + $0x12c] sm:$0xf0]  ;;  %v2478_v27 = vor.u32 %v2671_v17, %v2477_v16 }
  0x6b   : > { %1377 = vmatmul.bf16.vlgmr.msra.gmra.mxu1 %v3352_v53  ;;  %1426 = vmatpush.bf16.msrb.mxu0 %v2418_v58  ;;  %v1925_v25 = vld [vmem:[%s3251_s11 + $0x30] sm:$0xf]  ;;  %v2535_v26 = vld [vmem:[%s3251_s11 + $0x44] sm:$0xf0]  ;;  %v2532_v28 = vld [vmem:[%s3251_s11 + $0x34] sm:$0xf]  ;;  %v2382_v35 = vor.u32 %v2647_v20, %v2381_v19  ;;  %v2098_v39 = vor.u32 %v2574_v21, %v2095_v24 }
  0x6c   : > { %1445 = vmatpush.bf16.msrb.mxu1 %v2514_v49  ;;  %1396 = vmatmul.bf16.vlgmr.msra.gmra.mxu2 %v3354_v54  ;;  %v1927_v29 = vld [vmem:[%s3251_s11 + $0x48] sm:$0xf0]  ;;  %v1987_v31 = vld [vmem:[%s3262_s30 + $0x54] sm:$0xf0]  ;;  %v2465_v33 = vld [vmem:[%s3262_s30 + $0x408] sm:$0xf] }
  0x6d   : > { %1464 = vmatpush.bf16.msrb.mxu2 %v2038_v44  ;;  %1415 = vmatmul.bf16.vlgmr.msra.gmra.mxu3 %v3358_v57  ;;  %v2547_v30 = vld [vmem:[%s3262_s30 + $0x4c] sm:$0xf]  ;;  %v1933_v32 = vld [vmem:[%s3251_s11 + $0x38] sm:$0xf]  ;;  %v2668_v34 = vld [vmem:[%s3262_s30 + $0x410] sm:$0xf0]  ;;  %v3399_v44 = vor.u32 %v2535_v26, %v1925_v25  ;;  %v3404_v50 = vor.u32 %v2532_v28, %v1927_v29 }
  0x6e   : > { %1483 = vmatpush.bf16.msrb.mxu3 %v2134_v59  ;;  %v2536_v36 = vld [vmem:[%s3251_s11 + $0x4c] sm:$0xf0]  ;;  %v2533_v37 = vld [vmem:[%s3251_s11 + $0x3c] sm:$0xf]  ;;  %v1935_v38 = vld [vmem:[%s3251_s11 + $0x50] sm:$0xf0]  ;;  %v1990_v40 = vor.u32 %v2547_v30, %v1987_v31  ;;  %v2466_v45 = vor.u32 %v2668_v34, %v2465_v33 }
  0x6f   : > { %1427 = vmatpush.bf16.msrb.mxu0 %v2406_v6  ;;  %v2369_v41 = vld [vmem:[%s3262_s30 + $0x348] sm:$0xf]  ;;  %v2644_v42 = vld [vmem:[%s3262_s30 + $0x350] sm:$0xf0]  ;;  %v2571_v43 = vld [vmem:[%s3262_s30 + $0x10c] sm:$0xf]  ;;  %v3406_v51 = vor.u32 %v2536_v36, %v1933_v32  ;;  %v3410_v56 = vor.u32 %v2533_v37, %v1935_v38 }
  0x70   : > { %1446 = vmatpush.bf16.msrb.mxu1 %v2502_v0  ;;  %v2083_v46 = vld [vmem:[%s3262_s30 + $0x114] sm:$0xf0]  ;;  %v2544_v47 = vld [vmem:[%s3262_s30 + $0x34] sm:$0xf]  ;;  %v1975_v49 = vld [vmem:[%s3262_s30 + $0x3c] sm:$0xf0]  ;;  %v2370_v58 = vor.u32 %v2644_v42, %v2369_v41 }
  0x71   : > { %1465 = vmatpush.bf16.msrb.mxu2 %v2026_v60  ;;  %v2453_v52 = vld [vmem:[%s3262_s30 + $0x3f0] sm:$0xf]  ;;  %v2665_v55 = vld [vmem:[%s3262_s30 + $0x3f8] sm:$0xf0]  ;;  %v2086_v59 = vor.u32 %v2571_v43, %v2083_v46  ;;  %v1978_v60 = vor.u32 %v2544_v47, %v1975_v49  ;;  %v2568_v63 = vld [vmem:[%s3262_s30 + $0xf4] sm:$0xf] }
  0x72   : > { %1484 = vmatpush.bf16.msrb.mxu3 %v2122_v7  ;;  %v2357_v61 = vld [vmem:[%s3262_s30 + $0x330] sm:$0xf]  ;;  %v2641_v62 = vld [vmem:[%s3262_s30 + $0x338] sm:$0xf0]  ;;  %v2454_v0 = vor.u32 %v2665_v55, %v2453_v52  ;;  %v2071_v1 = vld [vmem:[%s3262_s30 + $0xfc] sm:$0xf0] }
  0x73   : > { %1428 = vmatpush.bf16.msrb.mxu0 %v2394_v18  ;;  %v2541_v2 = vld [vmem:[%s3262_s30 + $0x1c] sm:$0xf]  ;;  %v1963_v3 = vld [vmem:[%s3262_s30 + $0x24] sm:$0xf0]  ;;  %v2441_v4 = vld [vmem:[%s3262_s30 + $0x3d8] sm:$0xf]  ;;  %v2358_v6 = vor.u32 %v2641_v62, %v2357_v61 }
  0x74   : > { %1447 = vmatpush.bf16.msrb.mxu1 %v2490_v12  ;;  %v2662_v5 = vld [vmem:[%s3262_s30 + $0x3e0] sm:$0xf0]  ;;  %v2345_v7 = vld [vmem:[%s3262_s30 + $0x318] sm:$0xf]  ;;  %v1966_v9 = vor.u32 %v2541_v2, %v1963_v3  ;;  %v2565_v11 = vld [vmem:[%s3262_s30 + $0xdc] sm:$0xf] }
  0x75   : > { %1466 = vmatpush.bf16.msrb.mxu2 %v2014_v8  ;;  %v2074_v8 = vor.u32 %v2568_v63, %v2071_v1  ;;  %v2638_v10 = vld [vmem:[%s3262_s30 + $0x320] sm:$0xf0]  ;;  %v2059_v12 = vld [vmem:[%s3262_s30 + $0xe4] sm:$0xf0]  ;;  %v2442_v13 = vor.u32 %v2662_v5, %v2441_v4  ;;  %v1951_v15 = vld [vmem:[%s3262_s30 + $0xc] sm:$0xf0] }
  0x76   : > { %1485 = vmatpush.bf16.msrb.mxu3 %v2110_v22  ;;  %v2538_v14 = vld [vmem:[%s3262_s30 + $0x4] sm:$0xf]  ;;  %v2429_v16 = vld [vmem:[%s3262_s30 + $0x3c0] sm:$0xf]  ;;  %v2659_v17 = vld [vmem:[%s3262_s30 + $0x3c8] sm:$0xf0]  ;;  %v2346_v20 = vor.u32 %v2638_v10, %v2345_v7  ;;  %v2062_v24 = vor.u32 %v2565_v11, %v2059_v12 }
  0x77   : > { %1429 = vmatpush.bf16.msrb.mxu0 %v2382_v35  ;;  %v2655_v18 = vld [vmem:[%s3262_s30 + $0x3ac] sm:$0xf]  ;;  %v2419_v19 = vld [vmem:[%s3262_s30 + $0x3b4] sm:$0xf0]  ;;  %v2333_v21 = vld [vmem:[%s3262_s30 + $0x300] sm:$0xf]  ;;  %v1954_v25 = vor.u32 %v2538_v14, %v1951_v15  ;;  %v2430_v29 = vor.u32 %v2659_v17, %v2429_v16 }
  0x78   : > { %1448 = vmatpush.bf16.msrb.mxu1 %v2478_v27  ;;  %v2631_v22 = vld [vmem:[%s3262_s30 + $0x2ec] sm:$0xf]  ;;  %v2562_v27 = vld [vmem:[%s3262_s30 + $0xc4] sm:$0xf]  ;;  %v2047_v28 = vld [vmem:[%s3262_s30 + $0xcc] sm:$0xf0]  ;;  %v2422_v31 = vor.u32 %v2655_v18, %v2419_v19 }
  0x79   : > { %1467 = vmatpush.bf16.msrb.mxu2 %v2002_v23  ;;  %v2323_v23 = vld [vmem:[%s3262_s30 + $0x2f4] sm:$0xf0]  ;;  %v2635_v26 = vld [vmem:[%s3262_s30 + $0x308] sm:$0xf0]  ;;  %v1917_v30 = vld [vmem:[%s3251_s11 + $0x10] sm:$0xf]  ;;  %v2050_v43 = vor.u32 %v2562_v27, %v2047_v28 }
  0x7a   : > { %1486 = vmatpush.bf16.msrb.mxu3 %v2098_v39  ;;  %1363 = vmatmul.bf16.gmra.mxu0 %v3399_v44  ;;  %v2607_v32 = vld [vmem:[%s3262_s30 + $0x22c] sm:$0xf]  ;;  %v2227_v33 = vld [vmem:[%s3262_s30 + $0x234] sm:$0xf0]  ;;  %v2326_v35 = vor.u32 %v2631_v22, %v2323_v23  ;;  %v2652_v37 = vld [vmem:[%s3262_s30 + $0x394] sm:$0xf]  ;;  %v2334_v39 = vor.u32 %v2635_v26, %v2333_v21 }
  0x7b   : > { %1382 = vmatmul.bf16.gmra.mxu1 %v3404_v50  ;;  %1430 = vmatpush.bf16.msrb.mxu0 %v2370_v58  ;;  %v2679_v34 = vld [vmem:[%s3262_s30 + $0x46c] sm:$0xf]  ;;  %v2515_v36 = vld [vmem:[%s3262_s30 + $0x474] sm:$0xf0]  ;;  %v2407_v38 = vld [vmem:[%s3262_s30 + $0x39c] sm:$0xf0] }
  0x7c   : > { %1449 = vmatpush.bf16.msrb.mxu1 %v2466_v45  ;;  %1401 = vmatmul.bf16.gmra.mxu2 %v3406_v51  ;;  %v2528_v41 = vld [vmem:[%s3251_s11 + $0x14] sm:$0xf]  ;;  %v1919_v42 = vld [vmem:[%s3251_s11 + $0x28] sm:$0xf0]  ;;  %v2230_v45 = vor.u32 %v2607_v32, %v2227_v33  ;;  %v2215_v47 = vld [vmem:[%s3262_s30 + $0x21c] sm:$0xf0]  ;;  %v2518_v49 = vor.u32 %v2679_v34, %v2515_v36  ;;  %v2410_v52 = vor.u32 %v2652_v37, %v2407_v38 }
  0x7d   : > { %1468 = vmatpush.bf16.msrb.mxu2 %v1990_v40  ;;  %1420 = vmatmul.bf16.gmra.mxu3 %v3410_v56  ;;  %v2531_v40 = vld [vmem:[%s3251_s11 + $0x24] sm:$0xf0]  ;;  %v2604_v46 = vld [vmem:[%s3262_s30 + $0x214] sm:$0xf]  ;;  %v2311_v58 = vld [vmem:[%s3262_s30 + $0x2dc] sm:$0xf0]  ;;  %v3457_v61 = vor.u32 %v2528_v41, %v1919_v42 }
  0x7e   : > { %1487 = vmatpush.bf16.msrb.mxu3 %v2086_v59  ;;  %v2628_v55 = vld [vmem:[%s3262_s30 + $0x2d4] sm:$0xf]  ;;  %v2503_v62 = vld [vmem:[%s3262_s30 + $0x45c] sm:$0xf0]  ;;  %v2649_v63 = vld [vmem:[%s3262_s30 + $0x37c] sm:$0xf]  ;;  %v2218_v1 = vor.u32 %v2604_v46, %v2215_v47 }
  0x7f   : > { %1431 = vmatpush.bf16.msrb.mxu0 %v2358_v6  ;;  %v2676_v59 = vld [vmem:[%s3262_s30 + $0x454] sm:$0xf]  ;;  %v2314_v2 = vor.u32 %v2628_v55, %v2311_v58  ;;  %v2601_v3 = vld [vmem:[%s3262_s30 + $0x1fc] sm:$0xf]  ;;  %v2203_v4 = vld [vmem:[%s3262_s30 + $0x204] sm:$0xf0] }
  0x80   : > { %1450 = vmatpush.bf16.msrb.mxu1 %v2454_v0  ;;  %v2395_v0 = vld [vmem:[%s3262_s30 + $0x384] sm:$0xf0]  ;;  %v2506_v5 = vor.u32 %v2676_v59, %v2503_v62  ;;  %v2625_v7 = vld [vmem:[%s3262_s30 + $0x2bc] sm:$0xf]  ;;  %v2646_v11 = vld [vmem:[%s3262_s30 + $0x364] sm:$0xf] }
  0x81   : > { %1469 = vmatpush.bf16.msrb.mxu2 %v1978_v60  ;;  %v3455_v60 = vor.u32 %v2531_v40, %v1917_v30  ;;  %v2398_v6 = vor.u32 %v2649_v63, %v2395_v0  ;;  %v2491_v10 = vld [vmem:[%s3262_s30 + $0x444] sm:$0xf0]  ;;  %v2383_v12 = vld [vmem:[%s3262_s30 + $0x36c] sm:$0xf0]  ;;  %v2598_v15 = vld [vmem:[%s3262_s30 + $0x1e4] sm:$0xf] }
  0x82   : > { %1488 = vmatpush.bf16.msrb.mxu3 %v2074_v8  ;;  %v2299_v8 = vld [vmem:[%s3262_s30 + $0x2c4] sm:$0xf0]  ;;  %v2191_v16 = vld [vmem:[%s3262_s30 + $0x1ec] sm:$0xf0]  ;;  %v2386_v18 = vor.u32 %v2646_v11, %v2383_v12  ;;  %v2622_v19 = vld [vmem:[%s3262_s30 + $0x2a4] sm:$0xf] }
  0x83   : > { %1432 = vmatpush.bf16.msrb.mxu0 %v2346_v20  ;;  %v2302_v14 = vor.u32 %v2625_v7, %v2299_v8  ;;  %v2287_v20 = vld [vmem:[%s3262_s30 + $0x2ac] sm:$0xf0]  ;;  %v2670_v21 = vld [vmem:[%s3262_s30 + $0x424] sm:$0xf]  ;;  %v2643_v23 = vld [vmem:[%s3262_s30 + $0x34c] sm:$0xf] }
  0x84   : > { %1451 = vmatpush.bf16.msrb.mxu1 %v2442_v13  ;;  %v2206_v13 = vor.u32 %v2601_v3, %v2203_v4  ;;  %v2479_v22 = vld [vmem:[%s3262_s30 + $0x42c] sm:$0xf0]  ;;  %v2290_v26 = vor.u32 %v2622_v19, %v2287_v20  ;;  %v2595_v27 = vld [vmem:[%s3262_s30 + $0x1cc] sm:$0xf]  ;;  %v2179_v28 = vld [vmem:[%s3262_s30 + $0x1d4] sm:$0xf0] }
  0x85   : > { %1470 = vmatpush.bf16.msrb.mxu2 %v1966_v9  ;;  %v2673_v9 = vld [vmem:[%s3262_s30 + $0x43c] sm:$0xf]  ;;  %v1941_v30 = vld [vmem:[%s3251_s11 + $0x40] sm:$0xf]  ;;  %v2619_v32 = vld [vmem:[%s3262_s30 + $0x28c] sm:$0xf]  ;;  %v2182_v41 = vor.u32 %v2595_v27, %v2179_v28 }
  0x86   : > { %1489 = vmatpush.bf16.msrb.mxu3 %v2062_v24  ;;  %v2494_v17 = vor.u32 %v2673_v9, %v2491_v10  ;;  %v2371_v24 = vld [vmem:[%s3262_s30 + $0x354] sm:$0xf0]  ;;  %v2667_v34 = vld [vmem:[%s3262_s30 + $0x40c] sm:$0xf]  ;;  %v2640_v36 = vld [vmem:[%s3262_s30 + $0x334] sm:$0xf] }
  0x87   : > { %1433 = vmatpush.bf16.msrb.mxu0 %v2334_v39  ;;  %v2275_v33 = vld [vmem:[%s3262_s30 + $0x294] sm:$0xf0]  ;;  %v2359_v37 = vld [vmem:[%s3262_s30 + $0x33c] sm:$0xf0]  ;;  %v2534_v39 = vld [vmem:[%s3251_s11 + $0x44] sm:$0xf] }
  0x88   : > { %1452 = vmatpush.bf16.msrb.mxu1 %v2430_v29  ;;  %v2482_v29 = vor.u32 %v2670_v21, %v2479_v22  ;;  %v2537_v38 = vld [vmem:[%s3251_s11 + $0x54] sm:$0xf0]  ;;  %v1943_v40 = vld [vmem:[%s3251_s11 + $0x58] sm:$0xf0]  ;;  %v2278_v42 = vor.u32 %v2619_v32, %v2275_v33  ;;  %v2362_v47 = vor.u32 %v2640_v36, %v2359_v37  ;;  %v2664_v55 = vld [vmem:[%s3262_s30 + $0x3f4] sm:$0xf] }
  0x89   : > { %1471 = vmatpush.bf16.msrb.mxu2 %v1954_v25  ;;  %v2194_v25 = vor.u32 %v2598_v15, %v2191_v16  ;;  %v3499_v58 = vor.u32 %v2537_v38, %v1941_v30  ;;  %v3501_v59 = vor.u32 %v2534_v39, %v1943_v40  ;;  %v2455_v62 = vld [vmem:[%s3262_s30 + $0x3fc] sm:$0xf0]  ;;  %v2637_v63 = vld [vmem:[%s3262_s30 + $0x31c] sm:$0xf]  ;;  %v2347_v0 = vld [vmem:[%s3262_s30 + $0x324] sm:$0xf0] }
  0x8a   : > { %1490 = vmatpush.bf16.msrb.mxu3 %v2050_v43  ;;  %1434 = vmatmul.bf16.vlgmr.msrb.gmra.mxu0 %v3455_v60  ;;  %v2592_v43 = vld [vmem:[%s3262_s30 + $0x1b4] sm:$0xf]  ;;  %v2589_v3 = vld [vmem:[%s3262_s30 + $0x19c] sm:$0xf]  ;;  %v2155_v4 = vld [vmem:[%s3262_s30 + $0x1a4] sm:$0xf0] }
  0x8b   : > { %1502 = vmatpush.bf16.msra.mxu0 %v2230_v45  ;;  %1453 = vmatmul.bf16.vlgmr.msrb.gmra.mxu1 %v3457_v61  ;;  %v2167_v45 = vld [vmem:[%s3262_s30 + $0x1bc] sm:$0xf0]  ;;  %v2613_v7 = vld [vmem:[%s3262_s30 + $0x25c] sm:$0xf]  ;;  %v2251_v8 = vld [vmem:[%s3262_s30 + $0x264] sm:$0xf0]  ;;  %v2158_v15 = vor.u32 %v2589_v3, %v2155_v4 }
  0x8c   : > { %1521 = vmatpush.bf16.msra.mxu1 %v2326_v35  ;;  %1472 = vmatmul.bf16.vlgmr.msrb.gmra.mxu2 %v3347_v48  ;;  %v2467_v35 = vld [vmem:[%s3262_s30 + $0x414] sm:$0xf0]  ;;  %v2661_v9 = vld [vmem:[%s3262_s30 + $0x3dc] sm:$0xf]  ;;  %v2443_v10 = vld [vmem:[%s3262_s30 + $0x3e4] sm:$0xf0]  ;;  %v2254_v16 = vor.u32 %v2613_v7, %v2251_v8 }
  0x8d   : > { %1540 = vmatpush.bf16.msra.mxu2 %v2422_v31  ;;  %1491 = vmatmul.bf16.vlgmr.msrb.gmra.mxu3 %v3352_v53  ;;  %v2374_v31 = vor.u32 %v2643_v23, %v2371_v24  ;;  %v2470_v46 = vor.u32 %v2667_v34, %v2467_v35  ;;  %v2634_v11 = vld [vmem:[%s3262_s30 + $0x304] sm:$0xf]  ;;  %v2335_v12 = vld [vmem:[%s3262_s30 + $0x30c] sm:$0xf0]  ;;  %v2446_v20 = vor.u32 %v2661_v9, %v2443_v10  ;;  %v2561_v27 = vld [vmem:[%s3262_s30 + $0xb8] sm:$0xf0] }
  0x8e   : > { %1559 = vmatpush.bf16.msra.mxu3 %v2518_v49  ;;  %v2616_v49 = vld [vmem:[%s3262_s30 + $0x274] sm:$0xf]  ;;  %v2610_v19 = vld [vmem:[%s3262_s30 + $0x244] sm:$0xf]  ;;  %v2338_v21 = vor.u32 %v2634_v11, %v2335_v12  ;;  %v2239_v22 = vld [vmem:[%s3262_s30 + $0x24c] sm:$0xf0] }
  0x8f   : > { %1503 = vmatpush.bf16.msra.mxu0 %v2218_v1  ;;  %v2170_v1 = vor.u32 %v2592_v43, %v2167_v45  ;;  %v2658_v23 = vld [vmem:[%s3262_s30 + $0x3c4] sm:$0xf]  ;;  %v2431_v24 = vld [vmem:[%s3262_s30 + $0x3cc] sm:$0xf0]  ;;  %v2242_v33 = vor.u32 %v2610_v19, %v2239_v22  ;;  %v2221_v34 = vld [vmem:[%s3262_s30 + $0x218] sm:$0xf] }
  0x90   : > { %1522 = vmatpush.bf16.msra.mxu1 %v2314_v2  ;;  %v2137_v28 = vld [vmem:[%s3262_s30 + $0x170] sm:$0xf]  ;;  %v2606_v35 = vld [vmem:[%s3262_s30 + $0x220] sm:$0xf0]  ;;  %v2434_v36 = vor.u32 %v2658_v23, %v2431_v24  ;;  %v2029_v40 = vld [vmem:[%s3262_s30 + $0x98] sm:$0xf] }
  0x91   : > { %1541 = vmatpush.bf16.msra.mxu2 %v2410_v52  ;;  %v2263_v52 = vld [vmem:[%s3262_s30 + $0x27c] sm:$0xf0]  ;;  %v2329_v30 = vld [vmem:[%s3262_s30 + $0x2f0] sm:$0xf]  ;;  %v2125_v43 = vld [vmem:[%s3262_s30 + $0x158] sm:$0xf] }
  0x92   : > { %1560 = vmatpush.bf16.msra.mxu3 %v2506_v5  ;;  %v2266_v2 = vor.u32 %v2616_v49, %v2263_v52  ;;  %v2458_v5 = vor.u32 %v2664_v55, %v2455_v62  ;;  %v2582_v45 = vld [vmem:[%s3262_s30 + $0x160] sm:$0xf0]  ;;  %v2209_v52 = vld [vmem:[%s3262_s30 + $0x200] sm:$0xf]  ;;  %v2603_v55 = vld [vmem:[%s3262_s30 + $0x208] sm:$0xf0] }
  0x93   : > { %1504 = vmatpush.bf16.msra.mxu0 %v2206_v13  ;;  %v2233_v13 = vld [vmem:[%s3262_s30 + $0x230] sm:$0xf]  ;;  %v2630_v49 = vld [vmem:[%s3262_s30 + $0x2e0] sm:$0xf0]  ;;  %v2017_v62 = vld [vmem:[%s3262_s30 + $0x80] sm:$0xf]  ;;  %v2210_v4 = vor.u32 %v2603_v55, %v2209_v52 }
  0x94   : > { %1523 = vmatpush.bf16.msra.mxu1 %v2302_v14  ;;  %v2609_v14 = vld [vmem:[%s3262_s30 + $0x238] sm:$0xf0]  ;;  %v2579_v3 = vld [vmem:[%s3262_s30 + $0x148] sm:$0xf0]  ;;  %v2197_v8 = vld [vmem:[%s3262_s30 + $0x1e8] sm:$0xf] }
  0x95   : > { %1542 = vmatpush.bf16.msra.mxu2 %v2398_v6  ;;  %v2350_v6 = vor.u32 %v2637_v63, %v2347_v0  ;;  %v2555_v63 = vld [vmem:[%s3262_s30 + $0x88] sm:$0xf0]  ;;  %v2126_v0 = vor.u32 %v2582_v45, %v2125_v43  ;;  %v2600_v9 = vld [vmem:[%s3262_s30 + $0x1f0] sm:$0xf0]  ;;  %v2005_v10 = vld [vmem:[%s3262_s30 + $0x68] sm:$0xf] }
  0x96   : > { %1561 = vmatpush.bf16.msra.mxu3 %v2494_v17  ;;  %v2586_v17 = vld [vmem:[%s3262_s30 + $0x184] sm:$0xf]  ;;  %v2627_v7 = vld [vmem:[%s3262_s30 + $0x2c8] sm:$0xf0]  ;;  %v2552_v11 = vld [vmem:[%s3262_s30 + $0x70] sm:$0xf0] }
  0x97   : > { %1505 = vmatpush.bf16.msra.mxu0 %v2194_v25  ;;  %v2234_v25 = vor.u32 %v2609_v14, %v2233_v13  ;;  %v2101_v14 = vld [vmem:[%s3262_s30 + $0x128] sm:$0xf]  ;;  %v2624_v19 = vld [vmem:[%s3262_s30 + $0x2b0] sm:$0xf0]  ;;  %v1993_v22 = vld [vmem:[%s3262_s30 + $0x50] sm:$0xf] }
  0x98   : > { %1524 = vmatpush.bf16.msra.mxu1 %v2290_v26  ;;  %v2041_v26 = vld [vmem:[%s3262_s30 + $0xb0] sm:$0xf]  ;;  %v2549_v23 = vld [vmem:[%s3262_s30 + $0x58] sm:$0xf0]  ;;  %v2618_v43 = vld [vmem:[%s3262_s30 + $0x280] sm:$0xf0] }
  0x99   : > { %1543 = vmatpush.bf16.msra.mxu2 %v2386_v18  ;;  %v2143_v18 = vld [vmem:[%s3262_s30 + $0x18c] sm:$0xf0]  ;;  %v2042_v37 = vor.u32 %v2561_v27, %v2041_v26  ;;  %v2573_v27 = vld [vmem:[%s3262_s30 + $0x118] sm:$0xf0]  ;;  %v2161_v45 = vld [vmem:[%s3262_s30 + $0x1a0] sm:$0xf] }
  0x9a   : > { %1562 = vmatpush.bf16.msra.mxu3 %v2482_v29  ;;  %1439 = vmatmul.bf16.gmra.mxu0 %v3499_v58  ;;  %v2585_v29 = vld [vmem:[%s3262_s30 + $0x178] sm:$0xf0]  ;;  %v2146_v32 = vor.u32 %v2586_v17, %v2143_v18  ;;  %v2006_v17 = vor.u32 %v2552_v11, %v2005_v10  ;;  %v2293_v18 = vld [vmem:[%s3262_s30 + $0x2a8] sm:$0xf]  ;;  %v2089_v26 = vld [vmem:[%s3262_s30 + $0x110] sm:$0xf] }
  0x9b   : > { %1506 = vmatpush.bf16.msra.mxu0 %v2182_v41  ;;  %1458 = vmatmul.bf16.gmra.mxu1 %v3501_v59  ;;  %v2138_v38 = vor.u32 %v2585_v29, %v2137_v28  ;;  %v2558_v41 = vld [vmem:[%s3262_s30 + $0xa0] sm:$0xf0]  ;;  %v1994_v29 = vor.u32 %v2549_v23, %v1993_v22  ;;  %s271_s24 = scalar_lea.vmem [#allocation7], %s2706_s23  ;;  %s2707_s10 = smul.u32 96, %s3259_s18 }
  0x9c   : > { %1525 = vmatpush.bf16.msra.mxu1 %v2278_v42  ;;  %1477 = vmatmul.bf16.gmra.mxu2 %v3399_v44  ;;  %v2222_v42 = vor.u32 %v2606_v35, %v2221_v34  ;;  %v1981_v34 = vld [vmem:[%s3262_s30 + $0x38] sm:$0xf]  ;;  %v2546_v35 = vld [vmem:[%s3262_s30 + $0x40] sm:$0xf0]  ;;  %s3758_s8 = sld [smem:[#allocation14_spill]]  ;;  %s1729_s11 = scalar_lea.sflag [#allocation4], %s3259_s18 }
  0x9d   : > { %1544 = vmatpush.bf16.msra.mxu2 %v2374_v31  ;;  %1496 = vmatmul.bf16.gmra.mxu3 %v3404_v50  ;;  %v2633_v31 = vld [vmem:[%s3262_s30 + $0x2f8] sm:$0xf0]  ;;  %v2654_v22 = vld [vmem:[%s3262_s30 + $0x3a0] sm:$0xf0]  ;;  %s3645_s26 = scalar_lea.vmem [#allocation8], %s2707_s10  ;;  %s3759_s7 = sld [smem:[#allocation15_spill]] }
  0x9e   : > { %1563 = vmatpush.bf16.msra.mxu3 %v2470_v46  ;;  %v2330_v39 = vor.u32 %v2633_v31, %v2329_v30  ;;  %v2030_v46 = vor.u32 %v2558_v41, %v2029_v40  ;;  %v2281_v30 = vld [vmem:[%s3262_s30 + $0x290] sm:$0xf]  ;;  %v2621_v31 = vld [vmem:[%s3262_s30 + $0x298] sm:$0xf0]  ;;  %v1982_v41 = vor.u32 %v2546_v35, %v1981_v34  ;;  %s3760_s15 = sld [smem:[#allocation24_spill]]  ;;  %s1746_s12 = sshll.u32 %s3645_s26, 4  ;;  %s1747_s12 = int_to_ptr.vmem [resolvable:$true] %s1746_s12 }
  0x9f   : > { %1507 = vmatpush.bf16.msra.mxu0 %v2170_v1 }
  0xa0   : > { %1526 = vmatpush.bf16.msra.mxu1 %v2266_v2  ;;  %v2113_v2 = vld [vmem:[%s3262_s30 + $0x140] sm:$0xf] }
  0xa1   : > { %1545 = vmatpush.bf16.msra.mxu2 %v2362_v47  ;;  %v2317_v47 = vld [vmem:[%s3262_s30 + $0x2d8] sm:$0xf]  ;;  %v2114_v12 = vor.u32 %v2579_v3, %v2113_v2  ;;  %v2257_v2 = vld [vmem:[%s3262_s30 + $0x260] sm:$0xf]  ;;  %v2615_v3 = vld [vmem:[%s3262_s30 + $0x268] sm:$0xf0] }
  0xa2   : > { %1564 = vmatpush.bf16.msra.mxu3 %v2458_v5  ;;  %v2318_v1 = vor.u32 %v2630_v49, %v2317_v47  ;;  %v2018_v5 = vor.u32 %v2555_v63, %v2017_v62  ;;  %v1969_v47 = vld [vmem:[%s3262_s30 + $0x20] sm:$0xf]  ;;  %v2543_v49 = vld [vmem:[%s3262_s30 + $0x28] sm:$0xf0]  ;;  %v2258_v11 = vor.u32 %v2615_v3, %v2257_v2  ;;  %s1737_s27 = smul.u32 3, %s3758_s8 }
  0xa3   : > { %1508 = vmatpush.bf16.msra.mxu0 %v2158_v15  ;;  %v2576_v15 = vld [vmem:[%s3262_s30 + $0x130] sm:$0xf0]  ;;  %v2065_v62 = vld [vmem:[%s3262_s30 + $0xe0] sm:$0xf]  ;;  %v2567_v63 = vld [vmem:[%s3262_s30 + $0xe8] sm:$0xf0] }
  0xa4   : > { %1527 = vmatpush.bf16.msra.mxu1 %v2254_v16  ;;  %v2198_v16 = vor.u32 %v2600_v9, %v2197_v8  ;;  %v2102_v24 = vor.u32 %v2576_v15, %v2101_v14  ;;  %v2425_v8 = vld [vmem:[%s3262_s30 + $0x3b0] sm:$0xf]  ;;  %v2657_v9 = vld [vmem:[%s3262_s30 + $0x3b8] sm:$0xf0]  ;;  %v2066_v10 = vor.u32 %v2567_v63, %v2065_v62  ;;  %v2564_v15 = vld [vmem:[%s3262_s30 + $0xd0] sm:$0xf0]  ;;  %s3761_s5 = smov %s3760_s15 }
  0xa5   : > { %1546 = vmatpush.bf16.msra.mxu2 %v2350_v6  ;;  %v2305_v6 = vld [vmem:[%s3262_s30 + $0x2c0] sm:$0xf]  ;;  %v2639_v63 = vld [vmem:[%s3262_s30 + $0x328] sm:$0xf0]  ;;  %s2708_s25 = smul.u32 24, %s3759_s7  ;;  %s2938_s23 = scalar_lea.hbm %s3761_s5, 384 }
  0xa6   : > { %1565 = vmatpush.bf16.msra.mxu3 %v2446_v20  ;;  %v2306_v13 = vor.u32 %v2627_v7, %v2305_v6  ;;  %v2185_v20 = vld [vmem:[%s3262_s30 + $0x1d0] sm:$0xf]  ;;  %v1957_v6 = vld [vmem:[%s3262_s30 + $0x8] sm:$0xf]  ;;  %v2540_v7 = vld [vmem:[%s3262_s30 + $0x10] sm:$0xf0] }
  0xa7   : > { %1509 = vmatpush.bf16.msra.mxu0 %v2146_v32  ;;  %v2173_v32 = vld [vmem:[%s3262_s30 + $0x1b8] sm:$0xf]  ;;  %v1958_v14 = vor.u32 %v2540_v7, %v1957_v6  ;;  %v2353_v62 = vld [vmem:[%s3262_s30 + $0x320] sm:$0xf]  ;;  %v2437_v6 = vld [vmem:[%s3262_s30 + $0x3c8] sm:$0xf]  ;;  %s1743_s4 = sadd.s32 %s2708_s25, %s1737_s27 }
  0xa8   : > { %1528 = vmatpush.bf16.msra.mxu1 %v2242_v33  ;;  %v2594_v33 = vld [vmem:[%s3262_s30 + $0x1c0] sm:$0xf0]  ;;  %v2354_v2 = vor.u32 %v2639_v63, %v2353_v62  ;;  %v2660_v7 = vld [vmem:[%s3262_s30 + $0x3d0] sm:$0xf0]  ;;  %s2523_s6 = sshll.u32 %s1743_s4, 3 }
  0xa9   : > { %1547 = vmatpush.bf16.msra.mxu2 %v2338_v21  ;;  %v2597_v21 = vld [vmem:[%s3262_s30 + $0x1d8] sm:$0xf0]  ;;  %v2174_v40 = vor.u32 %v2594_v33, %v2173_v32  ;;  %v2497_v32 = vld [vmem:[%s3262_s30 + $0x440] sm:$0xf]  ;;  %v2675_v33 = vld [vmem:[%s3262_s30 + $0x448] sm:$0xf0]  ;;  %s1745_s9 = scalar_lea.hbm %s3760_s15, %s2523_s6 }
  0xaa   : > { %1566 = vmatpush.bf16.msra.mxu3 %v2434_v36  ;;  %1510 = vmatmul.bf16.vlgmr.msra.gmra.mxu0 %v3354_v54  ;;  %v2186_v28 = vor.u32 %v2597_v21, %v2185_v20  ;;  %v2090_v36 = vor.u32 %v2573_v27, %v2089_v26  ;;  %v2681_v20 = vld [vmem:[%s3262_s30 + $0x478] sm:$0xf0]  ;;  %v2413_v21 = vld [vmem:[%s3262_s30 + $0x398] sm:$0xf]  ;;  %v2498_v35 = vor.u32 %v2675_v33, %v2497_v32  ;;  %s1748_s17 = sshll.u32 %s1745_s9, 4  ;;  %s1749_s17 = int_to_ptr.hbm [resolvable:$true] %s1748_s17 }
  0xab   : > { %1578 = vmatpush.bf16.msrb.mxu0 %v2042_v37  ;;  %1529 = vmatmul.bf16.vlgmr.msra.gmra.mxu1 %v3358_v57  ;;  %v2282_v37 = vor.u32 %v2621_v31, %v2281_v30  ;;  %v2414_v26 = vor.u32 %v2654_v22, %v2413_v21  ;;  %v2509_v27 = vld [vmem:[%s3262_s30 + $0x458] sm:$0xf]  ;;  %v2401_v30 = vld [vmem:[%s3262_s30 + $0x380] sm:$0xf]  ;;  %v2651_v31 = vld [vmem:[%s3262_s30 + $0x388] sm:$0xf0] }
  0xac   : > { %1597 = vmatpush.bf16.msrb.mxu1 %v2138_v38  ;;  %1548 = vmatmul.bf16.vlgmr.msra.gmra.mxu2 %v3455_v60  ;;  %v2077_v38 = vld [vmem:[%s3262_s30 + $0xf8] sm:$0xf]  ;;  %v2402_v34 = vor.u32 %v2651_v31, %v2401_v30  ;;  %s2932_s3 = sshra.s32 %s1749_s17, 4  ;;  %s2933_s3 = int_to_ptr.hbm [resolvable:$true] %s2932_s3 }
  0xad   : > { %1616 = vmatpush.bf16.msrb.mxu2 %v2234_v25  ;;  %1567 = vmatmul.bf16.vlgmr.msra.gmra.mxu3 %v3457_v61  ;;  %v2294_v25 = vor.u32 %v2624_v19, %v2293_v18  ;;  %v2426_v18 = vor.u32 %v2657_v9, %v2425_v8  ;;  %v2521_v19 = vld [vmem:[%s3262_s30 + $0x470] sm:$0xf]  ;;  %v2438_v9 = vor.u32 %v2660_v7, %v2437_v6  ;;  %s2934_s19 = scalar_lea.hbm %s2933_s3, 96  ;;  %p2939_p2 = scmp.lt.s32.totalorder %s2933_s3, %s3761_s5 }
  0xae   : > { %1635 = vmatpush.bf16.msrb.mxu3 %v2330_v39  ;;  %v2570_v39 = vld [vmem:[%s3262_s30 + $0x100] sm:$0xf0]  ;;  %p2935_p5 = scmp.ne.s32.totalorder %s2933_s3, %s2934_s19  ;;  %p2940_p3 = scmp.lt.s32.totalorder %s2938_s23, %s2934_s19 }
  0xaf   : > { %1579 = vmatpush.bf16.msrb.mxu0 %v2030_v46  ;;  %v2591_v46 = vld [vmem:[%s3262_s30 + $0x1a8] sm:$0xf0]  ;;  %v2078_v52 = vor.u32 %v2570_v39, %v2077_v38  ;;  %v2485_v38 = vld [vmem:[%s3262_s30 + $0x428] sm:$0xf]  ;;  %v2672_v39 = vld [vmem:[%s3262_s30 + $0x430] sm:$0xf0] }
  0xb0   : > { %1598 = vmatpush.bf16.msrb.mxu1 %v2126_v0  ;;  %v2162_v0 = vor.u32 %v2591_v46, %v2161_v45  ;;  %v2365_v45 = vld [vmem:[%s3262_s30 + $0x338] sm:$0xf]  ;;  %v2642_v46 = vld [vmem:[%s3262_s30 + $0x340] sm:$0xf0]  ;;  %p2936_p10 = pnand %p2935_p5, %p3154_p8  ;;  %p2941_p4 = por %p2940_p3, %p2939_p2 }
  0xb1   : > { %1617 = vmatpush.bf16.msrb.mxu2 %v2222_v42  ;;  %v2269_v42 = vld [vmem:[%s3262_s30 + $0x278] sm:$0xf] }
  0xb2   : > { %1636 = vmatpush.bf16.msrb.mxu3 %v2318_v1  ;;  %v2270_v55 = vor.u32 %v2618_v43, %v2269_v42  ;;  %v1970_v1 = vor.u32 %v2543_v49, %v1969_v47  ;;  %v2377_v42 = vld [vmem:[%s3262_s30 + $0x350] sm:$0xf]  ;;  %v2461_v47 = vld [vmem:[%s3262_s30 + $0x3f8] sm:$0xf]  ;;  %v2666_v49 = vld [vmem:[%s3262_s30 + $0x400] sm:$0xf0]  ;;  %p2937_p12 = pneg %p2936_p10 }
  0xb3   : > { %1580 = vmatpush.bf16.msrb.mxu0 %v2018_v5  ;;  %v2588_v5 = vld [vmem:[%s3262_s30 + $0x190] sm:$0xf0]  ;;  %v2473_v43 = vld [vmem:[%s3262_s30 + $0x410] sm:$0xf] }
  0xb4   : > { %1599 = vmatpush.bf16.msrb.mxu1 %v2114_v12  ;;  %v2053_v12 = vld [vmem:[%s3262_s30 + $0xc8] sm:$0xf]  ;;  %p2942_p6 = pnand %p2941_p4, %p2937_p12 }
  0xb5   : > { %1618 = vmatpush.bf16.msrb.mxu2 %v2210_v4  ;;  %v2149_v4 = vld [vmem:[%s3262_s30 + $0x188] sm:$0xf]  ;;  %v2054_v23 = vor.u32 %v2564_v15, %v2053_v12  ;;  %v3641_v12 = vld [vmem:[%s271_s24] sm:$0x7] }
  0xb6   : > { %1637 = vmatpush.bf16.msrb.mxu3 %v2306_v13  ;;  %v2150_v13 = vor.u32 %v2588_v5, %v2149_v4  ;;  %v2341_v4 = vld [vmem:[%s3262_s30 + $0x308] sm:$0xf]  ;;  %v2636_v5 = vld [vmem:[%s3262_s30 + $0x310] sm:$0xf0] }
  0xb7   : > { %1581 = vmatpush.bf16.msrb.mxu0 %v2006_v17  ;;  %v2612_v17 = vld [vmem:[%s3262_s30 + $0x250] sm:$0xf0]  ;;  %v2342_v8 = vor.u32 %v2636_v5, %v2341_v4  ;;  %v517_v4 = vperm.slane %v3641_v12, 1 }
  0xb8   : > { %1600 = vmatpush.bf16.msrb.mxu1 %v2102_v24 }
  0xb9   : > { %1619 = vmatpush.bf16.msrb.mxu2 %v2198_v16  ;;  %v2245_v16 = vld [vmem:[%s3262_s30 + $0x248] sm:$0xf] }
  0xba   : > { %1638 = vmatpush.bf16.msrb.mxu3 %v2294_v25  ;;  %1515 = vmatmul.bf16.gmra.mxu0 %v3406_v51  ;;  %v2246_v24 = vor.u32 %v2612_v17, %v2245_v16  ;;  %v2522_v25 = vor.u32 %v2681_v20, %v2521_v19 }
  0xbb   : > { %1582 = vmatpush.bf16.msrb.mxu0 %v1994_v29  ;;  %1534 = vmatmul.bf16.gmra.mxu1 %v3410_v56 }
  0xbc   : > { %1601 = vmatpush.bf16.msrb.mxu1 %v2090_v36  ;;  %1553 = vmatmul.bf16.gmra.mxu2 %v3499_v58  ;;  %v2389_v36 = vld [vmem:[%s3262_s30 + $0x368] sm:$0xf] }
  0xbd   : > { %1620 = vmatpush.bf16.msrb.mxu2 %v2186_v28  ;;  %1572 = vmatmul.bf16.gmra.mxu3 %v3501_v59  ;;  %v2678_v28 = vld [vmem:[%s3262_s30 + $0x460] sm:$0xf0] }
  0xbe   : > { %1639 = vmatpush.bf16.msrb.mxu3 %v2282_v37  ;;  %v2510_v29 = vor.u32 %v2678_v28, %v2509_v27  ;;  %v2648_v37 = vld [vmem:[%s3262_s30 + $0x370] sm:$0xf0] }
  0xbf   : > { %1583 = vmatpush.bf16.msrb.mxu0 %v1982_v41  ;;  %v2486_v41 = vor.u32 %v2672_v39, %v2485_v38 }
  0xc0   : > { %1602 = vmatpush.bf16.msrb.mxu1 %v2078_v52  ;;  %v2366_v52 = vor.u32 %v2642_v46, %v2365_v45 }
  0xc1   : > { %1621 = vmatpush.bf16.msrb.mxu2 %v2174_v40  ;;  %v2390_v40 = vor.u32 %v2648_v37, %v2389_v36 }
  0xc2   : > { %1640 = vmatpush.bf16.msrb.mxu3 %v2270_v55  ;;  %v2462_v55 = vor.u32 %v2666_v49, %v2461_v47 }
  0xc3   : > { %1584 = vmatpush.bf16.msrb.mxu0 %v1970_v1  ;;  %v2663_v1 = vld [vmem:[%s3262_s30 + $0x3e8] sm:$0xf0] }
  0xc4   : > { %1603 = vmatpush.bf16.msrb.mxu1 %v2066_v10 }
  0xc5   : > { %1622 = vmatpush.bf16.msrb.mxu2 %v2162_v0  ;;  %v2449_v0 = vld [vmem:[%s3262_s30 + $0x3e0] sm:$0xf] }
  0xc6   : > { %1641 = vmatpush.bf16.msrb.mxu3 %v2258_v11  ;;  %v2450_v3 = vor.u32 %v2663_v1, %v2449_v0 }
  0xc7   : > { %1585 = vmatpush.bf16.msrb.mxu0 %v1958_v14  ;;  %v516_v14 = vperm.slane %v3641_v12, 0 }
  0xc8   : > { %1604 = vmatpush.bf16.msrb.mxu1 %v2054_v23 }
  0xc9   : > { %1623 = vmatpush.bf16.msrb.mxu2 %v2150_v13 }
  0xca   : > { %1642 = vmatpush.bf16.msrb.mxu3 %v2246_v24  ;;  %1586 = vmatmul.bf16.vlgmr.msrb.gmra.mxu0 %v3347_v48  ;;  %v2645_v48 = vld [vmem:[%s3262_s30 + $0x358] sm:$0xf0] }
  0xcb   : > { %1654 = vmatpush.bf16.msra.mxu0 %v2426_v18  ;;  %1605 = vmatmul.bf16.vlgmr.msrb.gmra.mxu1 %v3352_v53  ;;  %v2669_v53 = vld [vmem:[%s3262_s30 + $0x418] sm:$0xf0] }
  0xcc   : > { %1673 = vmatpush.bf16.msra.mxu1 %v2522_v25  ;;  %1624 = vmatmul.bf16.vlgmr.msrb.gmra.mxu2 %v3354_v54  ;;  %v2378_v54 = vor.u32 %v2645_v48, %v2377_v42 }
  0xcd   : > { %2682 = vmatpush.bf16.msra.mxu2 %v2426_v18  ;;  %1643 = vmatmul.bf16.vlgmr.msrb.gmra.mxu3 %v3358_v57  ;;  %v2474_v57 = vor.u32 %v2669_v53, %v2473_v43 }
  0xce   : > { %2690 = vmatpush.bf16.msra.mxu3 %v2522_v25 }
  0xcf   : > { %1655 = vmatpush.bf16.msra.mxu0 %v2414_v26 }
  0xd0   : > { %1674 = vmatpush.bf16.msra.mxu1 %v2510_v29 }
  0xd1   : > { %2683 = vmatpush.bf16.msra.mxu2 %v2414_v26 }
  0xd2   : > { %2691 = vmatpush.bf16.msra.mxu3 %v2510_v29 }
  0xd3   : > { %1656 = vmatpush.bf16.msra.mxu0 %v2402_v34 }
  0xd4   : > { %1675 = vmatpush.bf16.msra.mxu1 %v2498_v35 }
  0xd5   : > { %2684 = vmatpush.bf16.msra.mxu2 %v2402_v34 }
  0xd6   : > { %2692 = vmatpush.bf16.msra.mxu3 %v2498_v35 }
  0xd7   : > { %1657 = vmatpush.bf16.msra.mxu0 %v2390_v40 }
  0xd8   : > { %1676 = vmatpush.bf16.msra.mxu1 %v2486_v41 }
  0xd9   : > { %2685 = vmatpush.bf16.msra.mxu2 %v2390_v40 }
  0xda   : > { %2693 = vmatpush.bf16.msra.mxu3 %v2486_v41  ;;  %1591 = vmatmul.bf16.gmra.mxu0 %v3399_v44 }
  0xdb   : > { %1658 = vmatpush.bf16.msra.mxu0 %v2378_v54  ;;  %1610 = vmatmul.bf16.gmra.mxu1 %v3404_v50 }
  0xdc   : > { %1677 = vmatpush.bf16.msra.mxu1 %v2474_v57  ;;  %1629 = vmatmul.bf16.gmra.mxu2 %v3406_v51 }
  0xdd   : > { %2686 = vmatpush.bf16.msra.mxu2 %v2378_v54  ;;  %1648 = vmatmul.bf16.gmra.mxu3 %v3410_v56 }
  0xde   : > { %2694 = vmatpush.bf16.msra.mxu3 %v2474_v57 }
  0xdf   : > { %1659 = vmatpush.bf16.msra.mxu0 %v2366_v52 }
  0xe0   : > { %1678 = vmatpush.bf16.msra.mxu1 %v2462_v55 }
  0xe1   : > { %2687 = vmatpush.bf16.msra.mxu2 %v2366_v52 }
  0xe2   : > { %2695 = vmatpush.bf16.msra.mxu3 %v2462_v55 }
  0xe3   : > { %1660 = vmatpush.bf16.msra.mxu0 %v2354_v2 }
  0xe4   : > { %1679 = vmatpush.bf16.msra.mxu1 %v2450_v3 }
  0xe5   : > { %2688 = vmatpush.bf16.msra.mxu2 %v2354_v2 }
  0xe6   : > { %2696 = vmatpush.bf16.msra.mxu3 %v2450_v3 }
  0xe7   : > { %1661 = vmatpush.bf16.msra.mxu0 %v2342_v8  ;;  %v1359_v44 = vpop.f32.mrf.mxu0 }
  0xe8   : > { %1680 = vmatpush.bf16.msra.mxu1 %v2438_v9  ;;  %v1378_v10 = vpop.f32.mrf.mxu1 }
  0xe9   : > { %2689 = vmatpush.bf16.msra.mxu2 %v2342_v8 }
  0xea   : > { %2697 = vmatpush.bf16.msra.mxu3 %v2438_v9  ;;  %1662 = vmatmul.bf16.vlgmr.msra.gmra.mxu0 %v3455_v60 }
  0xeb   : > { %1681 = vmatmul.bf16.vlgmr.msra.gmra.mxu1 %v3457_v61  ;;  %v1360_v61 = vadd.f32 %v1359_v44, %v516_v14 }
  0xec   : > { %1667 = vmatmul.bf16.vlgmr.msra.gmra.mxu2 %v3499_v58 }
  0xed   : > { %1686 = vmatmul.bf16.vlgmr.msra.gmra.mxu3 %v3501_v59  ;;  %v1379_v58 = vadd.f32 %v1378_v10, %v1360_v61 }
  0xef   : > { %v1397_v50 = vpop.f32.mrf.mxu2  ;;  %v1361_v56 = vpop.f32.mrf.mxu0 }
  0xf0   : > { %v1416_v51 = vpop.f32.mrf.mxu3  ;;  %v1380_v11 = vpop.f32.mrf.mxu1  ;;  %v1398_v20 = vadd.f32 %v1397_v50, %v1379_v58  ;;  %v1362_v21 = vadd.f32 %v1361_v56, %v516_v14 }
  0xf2   : > { %v1417_v23 = vadd.f32 %v1416_v51, %v1398_v20  ;;  %v1381_v27 = vadd.f32 %v1380_v11, %v1362_v21 }
  0xf7   : > { %v1399_v13 = vpop.f32.mrf.mxu2  ;;  %v1364_v16 = vpop.f32.mrf.mxu0 }
  0xf8   : > { %v1418_v15 = vpop.f32.mrf.mxu3  ;;  %v1383_v60 = vpop.f32.mrf.mxu1  ;;  %v1400_v29 = vadd.f32 %v1399_v13, %v1381_v27  ;;  %v1365_v30 = vadd.f32 %v1364_v16, %v516_v14 }
  0xfa   : > { %v1419_v33 = vadd.f32 %v1418_v15, %v1400_v29  ;;  %v1384_v34 = vadd.f32 %v1383_v60, %v1365_v30 }
  0xff   : > { %v1402_v17 = vpop.f32.mrf.mxu2  ;;  %v1366_v59 = vpop.f32.mrf.mxu0 }
 0x100   : > { %v1421_v18 = vpop.f32.mrf.mxu3  ;;  %v1385_v19 = vpop.f32.mrf.mxu1  ;;  %v1403_v41 = vadd.f32 %v1402_v17, %v1384_v34  ;;  %v1367_v48 = vadd.f32 %v1366_v59, %v516_v14 }
 0x102   : > { %v1422_v53 = vadd.f32 %v1421_v18, %v1403_v41  ;;  %v1386_v49 = vadd.f32 %v1385_v19, %v1367_v48 }
 0x107   : > { %v1404_v22 = vpop.f32.mrf.mxu2  ;;  %v1435_v25 = vpop.f32.mrf.mxu0 }
 0x108   : > { %v1423_v24 = vpop.f32.mrf.mxu3  ;;  %v1454_v26 = vpop.f32.mrf.mxu1  ;;  %v1436_v28 = vadd.f32 %v1435_v25, %v1417_v23  ;;  %v1405_v55 = vadd.f32 %v1404_v22, %v1386_v49 }
 0x10a   : > { %v1455_v31 = vadd.f32 %v1454_v26, %v1436_v28  ;;  %v1424_v0 = vadd.f32 %v1423_v24, %v1405_v55 }
 0x10c   : > { %v1692_v32 = vmul.f32 0.01, %v1455_v31 }
 0x10e   : > { %v1704_v35 = vmax.f32 %v1455_v31, %v1692_v32 }
 0x10f   : > { %v1473_v36 = vpop.f32.mrf.mxu2  ;;  %v1437_v38 = vpop.f32.mrf.mxu0 }
 0x110   : > { %v1492_v37 = vpop.f32.mrf.mxu3  ;;  %v1456_v39 = vpop.f32.mrf.mxu1  ;;  %1716 = vst [vmem:[%s3645_s26] sm:$0xff] %v1704_v35  ;;  %v1438_v40 = vadd.f32 %v1437_v38, %v1419_v33  ;;  %v1474_v9 = vadd.f32 %v1473_v36, %v517_v4 }
 0x112   : > { %v1457_v42 = vadd.f32 %v1456_v39, %v1438_v40  ;;  %v1493_v56 = vadd.f32 %v1492_v37, %v1474_v9 }
 0x114   : > { %v1695_v43 = vmul.f32 0.01, %v1457_v42 }
 0x116   : > { %v1707_v54 = vmax.f32 %v1457_v42, %v1695_v43 }
 0x117   : > { %v1475_v57 = vpop.f32.mrf.mxu2  ;;  %v1440_v46 = vpop.f32.mrf.mxu0 }
 0x118   : > { %v1494_v45 = vpop.f32.mrf.mxu3  ;;  %v1459_v47 = vpop.f32.mrf.mxu1  ;;  %1719 = vst [vmem:[%s3645_s26 + $0x18] sm:$0xff] %v1707_v54  ;;  %v1441_v52 = vadd.f32 %v1440_v46, %v1422_v53  ;;  %v1476_v15 = vadd.f32 %v1475_v57, %v517_v4 }
 0x11a   : > { %v1460_v62 = vadd.f32 %v1459_v47, %v1441_v52  ;;  %v1495_v17 = vadd.f32 %v1494_v45, %v1476_v15 }
 0x11c   : > { %v1698_v63 = vmul.f32 0.01, %v1460_v62 }
 0x11e   : > { %v1710_v1 = vmax.f32 %v1460_v62, %v1698_v63 }
 0x11f   : > { %v1478_v2 = vpop.f32.mrf.mxu2  ;;  %v1442_v5 = vpop.f32.mrf.mxu0 }
 0x120   : > { %v1497_v3 = vpop.f32.mrf.mxu3  ;;  %v1461_v6 = vpop.f32.mrf.mxu1  ;;  %1722 = vst [vmem:[%s3645_s26 + $0x30] sm:$0xff] %v1710_v1  ;;  %v1443_v7 = vadd.f32 %v1442_v5, %v1424_v0  ;;  %v1479_v21 = vadd.f32 %v1478_v2, %v517_v4 }
 0x122   : > { %v1462_v8 = vadd.f32 %v1461_v6, %v1443_v7  ;;  %v1498_v27 = vadd.f32 %v1497_v3, %v1479_v21 }
 0x124   : > { %v1701_v44 = vmul.f32 0.01, %v1462_v8 }
 0x126   : > { %v1713_v10 = vmax.f32 %v1462_v8, %v1701_v44 }
 0x127   : > { %v1480_v50 = vpop.f32.mrf.mxu2  ;;  %v1511_v11 = vpop.f32.mrf.mxu0 }
 0x128   : > { %v1499_v51 = vpop.f32.mrf.mxu3  ;;  %v1530_v13 = vpop.f32.mrf.mxu1  ;;  %1725 = vst [vmem:[%s3645_s26 + $0x48] sm:$0xff] %v1713_v10  ;;  %v1512_v14 = vadd.f32 %v1511_v11, %v1493_v56  ;;  %v1481_v33 = vadd.f32 %v1480_v50, %v517_v4  ;;  %v518_v4 = vperm.slane %v3641_v12, 2 }
 0x12a   : > { %v1531_v16 = vadd.f32 %v1530_v13, %v1512_v14  ;;  %v1500_v39 = vadd.f32 %v1499_v51, %v1481_v33 }
 0x12f   : > { %v1549_v60 = vpop.f32.mrf.mxu2  ;;  %v1513_v18 = vpop.f32.mrf.mxu0 }
 0x130   : > { %v1568_v61 = vpop.f32.mrf.mxu3  ;;  %v1550_v58 = vadd.f32 %v1549_v60, %v1531_v16  ;;  %v1532_v59 = vpop.f32.mrf.mxu1  ;;  %v1514_v20 = vadd.f32 %v1513_v18, %v1495_v17 }
 0x132   : > { %v1569_v19 = vadd.f32 %v1568_v61, %v1550_v58  ;;  %v1533_v24 = vadd.f32 %v1532_v59, %v1514_v20 }
 0x134   : > { %v1693_v22 = vmul.f32 0.01, %v1569_v19 }
 0x136   : > { %v1705_v23 = vmax.f32 %v1569_v19, %v1693_v22 }
 0x137   : > { %v1551_v25 = vpop.f32.mrf.mxu2  ;;  %v1516_v29 = vpop.f32.mrf.mxu0 }
 0x138   : > { %v1570_v26 = vpop.f32.mrf.mxu3  ;;  %1717 = vst [vmem:[%s3645_s26 + $0x8] sm:$0xff] %v1705_v23  ;;  %v1552_v28 = vadd.f32 %v1551_v25, %v1533_v24  ;;  %v1535_v30 = vpop.f32.mrf.mxu1  ;;  %v1517_v32 = vadd.f32 %v1516_v29, %v1498_v27 }
 0x13a   : > { %v1571_v31 = vadd.f32 %v1570_v26, %v1552_v28  ;;  %v1536_v36 = vadd.f32 %v1535_v30, %v1517_v32 }
 0x13c   : > { %v1696_v34 = vmul.f32 0.01, %v1571_v31 }
 0x13e   : > { %v1708_v35 = vmax.f32 %v1571_v31, %v1696_v34 }
 0x13f   : > { %v1554_v37 = vpop.f32.mrf.mxu2  ;;  %v1518_v41 = vpop.f32.mrf.mxu0 }
 0x140   : > { %v1573_v38 = vpop.f32.mrf.mxu3  ;;  %1720 = vst [vmem:[%s3645_s26 + $0x20] sm:$0xff] %v1708_v35  ;;  %v1555_v40 = vadd.f32 %v1554_v37, %v1536_v36  ;;  %v1537_v42 = vpop.f32.mrf.mxu1  ;;  %v1519_v43 = vadd.f32 %v1518_v41, %v1500_v39 }
 0x142   : > { %v1574_v48 = vadd.f32 %v1573_v38, %v1555_v40  ;;  %v1538_v57 = vadd.f32 %v1537_v42, %v1519_v43 }
 0x144   : > { %v1699_v53 = vmul.f32 0.01, %v1574_v48 }
 0x146   : > { %v1711_v54 = vmax.f32 %v1574_v48, %v1699_v53 }
 0x147   : > { %v1556_v45 = vpop.f32.mrf.mxu2  ;;  %v1587_v49 = vpop.f32.mrf.mxu0 }
 0x148   : > { %v1575_v46 = vpop.f32.mrf.mxu3  ;;  %1723 = vst [vmem:[%s3645_s26 + $0x38] sm:$0xff] %v1711_v54  ;;  %v1557_v47 = vadd.f32 %v1556_v45, %v1538_v57  ;;  %v1606_v52 = vpop.f32.mrf.mxu1  ;;  %v1588_v9 = vadd.f32 %v1587_v49, %v518_v4 }
 0x14a   : > { %v1576_v55 = vadd.f32 %v1575_v46, %v1557_v47  ;;  %v1607_v44 = vadd.f32 %v1606_v52, %v1588_v9 }
 0x14c   : > { %v1702_v62 = vmul.f32 0.01, %v1576_v55 }
 0x14e   : > { %v1714_v63 = vmax.f32 %v1576_v55, %v1702_v62 }
 0x14f   : > { %v1625_v0 = vpop.f32.mrf.mxu2  ;;  %v1589_v2 = vpop.f32.mrf.mxu0 }
 0x150   : > { %v1644_v1 = vpop.f32.mrf.mxu3  ;;  %1726 = vst [vmem:[%s3645_s26 + $0x50] sm:$0xff] %v1714_v63  ;;  %v1608_v3 = vpop.f32.mrf.mxu1  ;;  %v1626_v13 = vadd.f32 %v1625_v0, %v1607_v44  ;;  %v1590_v14 = vadd.f32 %v1589_v2, %v518_v4 }
 0x152   : > { %v1645_v16 = vadd.f32 %v1644_v1, %v1626_v13  ;;  %v1609_v58 = vadd.f32 %v1608_v3, %v1590_v14 }
 0x157   : > { %v1627_v5 = vpop.f32.mrf.mxu2  ;;  %v1592_v7 = vpop.f32.mrf.mxu0 }
 0x158   : > { %v1646_v6 = vpop.f32.mrf.mxu3  ;;  %v1611_v8 = vpop.f32.mrf.mxu1  ;;  %v1593_v11 = vadd.f32 %v1592_v7, %v518_v4  ;;  %v1628_v19 = vadd.f32 %v1627_v5, %v1609_v58 }
 0x15a   : > { %v1612_v15 = vadd.f32 %v1611_v8, %v1593_v11  ;;  %v1647_v24 = vadd.f32 %v1646_v6, %v1628_v19 }
 0x15f   : > { %v1630_v10 = vpop.f32.mrf.mxu2  ;;  %v1594_v51 = vpop.f32.mrf.mxu0 }
 0x160   : > { %v1649_v50 = vpop.f32.mrf.mxu3  ;;  %v1613_v56 = vpop.f32.mrf.mxu1  ;;  %v1631_v59 = vadd.f32 %v1630_v10, %v1612_v15  ;;  %v1595_v21 = vadd.f32 %v1594_v51, %v518_v4 }
 0x162   : > { %v1650_v23 = vadd.f32 %v1649_v50, %v1631_v59  ;;  %v1614_v28 = vadd.f32 %v1613_v56, %v1595_v21 }
 0x167   : > { %v1632_v60 = vpop.f32.mrf.mxu2  ;;  %v1663_v12 = vpop.f32.mrf.mxu0 }
 0x168   : > { %v1651_v61 = vpop.f32.mrf.mxu3  ;;  %v1682_v17 = vpop.f32.mrf.mxu1  ;;  %v1664_v18 = vadd.f32 %v1663_v12, %v1645_v16  ;;  %v1633_v32 = vadd.f32 %v1632_v60, %v1614_v28 }
 0x16a   : > { %v1683_v20 = vadd.f32 %v1682_v17, %v1664_v18  ;;  %v1652_v38 = vadd.f32 %v1651_v61, %v1633_v32 }
 0x16c   : > { %v1694_v22 = vmul.f32 0.01, %v1683_v20 }
 0x16e   : > { %v1706_v25 = vmax.f32 %v1683_v20, %v1694_v22 }
 0x16f   : > { %v1668_v26 = vpop.f32.mrf.mxu2  ;;  %v1665_v30 = vpop.f32.mrf.mxu0 }
 0x170   : > { %v1687_v27 = vpop.f32.mrf.mxu3  ;;  %v1669_v29 = vadd.f32 %v1668_v26, %v1650_v23  ;;  %1718 = vst [vmem:[%s3645_s26 + $0x10] sm:$0xff] %v1706_v25  ;;  %v1666_v31 = vadd.f32 %v1665_v30, %v1647_v24  ;;  %v1684_v34 = vpop.f32.mrf.mxu1 }
 0x172   : > { %v1688_v33 = vadd.f32 %v1687_v27, %v1669_v29  ;;  %v1685_v35 = vadd.f32 %v1684_v34, %v1666_v31 }
 0x174   : > { %v1700_v36 = vmul.f32 0.01, %v1688_v33  ;;  %v1697_v37 = vmul.f32 0.01, %v1685_v35 }
 0x176   : > { %v1712_v39 = vmax.f32 %v1688_v33, %v1700_v36  ;;  %v1709_v40 = vmax.f32 %v1685_v35, %v1697_v37 }
 0x177   : > { %v1670_v41 = vpop.f32.mrf.mxu2 }
 0x178   : > { %1724 = vst [vmem:[%s3645_s26 + $0x40] sm:$0xff] %v1712_v39  ;;  %v1671_v42 = vadd.f32 %v1670_v41, %v1652_v38  ;;  %v1689_v48 = vpop.f32.mrf.mxu3 }
 0x179   : > { %1721 = vst [vmem:[%s3645_s26 + $0x28] sm:$0xff] %v1709_v40 }
 0x17a   : > { %v1690_v43 = vadd.f32 %v1689_v48, %v1671_v42 }
 0x17c   : > { %v1703_v53 = vmul.f32 0.01, %v1690_v43 }
 0x17e   : > { %v1715_v54 = vmax.f32 %v1690_v43, %v1703_v53 }
 0x180   : > { %1727 = vst [vmem:[%s3645_s26 + $0x58] sm:$0xff] %v1715_v54 }
 0x181   : > { %2945 = shalt.err (!%p2942_p6)
}
 0x182   : > { %s3050_s18 = smov 384   ;;  %s3051_s26 = smov 768  }
 0x183   : > { %s3052_s8 = smov 24  }
 0x184   : > { %2715 = dma.vmem_to_hbm [thread:$0]  (%p3154_p8), %s1747_s12, 1536, %s1749_s17, %s1729_s11, %s3050_s18, %s3051_s26, %s3052_s8  }
 0x185 PF: > { %s3763_s7 = sld [smem:[#allocation16_spill]] }
 0x186   : > { %s3764_s27 = sld [smem:[#allocation12_spill]] }
 0x18b   : > { %p2732_p7 = scmp.ge.s32.totalorder %s3763_s7, 2 }
 0x18c   : > { %s1763_s4 = sand.u32 1, %s3764_s27  }
 0x18d   : > { %p2728_p11 = pnand %p2732_p7, %p3161_p9  ;;  %s1764_s6 = scalar_lea.sflag [#allocation4], %s1763_s4 }
 0x18f   : > { %p2729_p13 = pneg %p2728_p11 }
 0x191   : > { %2999 = dma.done.wait (%p2729_p13), %s1764_s6, 1536  }
 0x192   : > { %3001 = vsyncadd (%p2729_p13), %s1764_s6, 4294965760  ;;  %s22_s22 = sadd.s32 1, %s3763_s7   ;;  %s3766_s29 = sld [smem:[#allocation21_spill]] }
 0x193   : > { %p19_p1 = scmp.ge.s32.totalorder %s22_s22, 6   ;;  %s3767_s28 = sld [smem:[#allocation13_spill]] }
 0x194   : > { %s3768_s17 = sld [smem:[#allocation22_spill]]  ;;  %s3771_s12 = smov %s3008_s13 }
 0x195   : > { %s3769_s9 = sld [smem:[#allocation17_spill]]  ;;  %s3772_s13 = smov %s3012_s14 }
 0x196   : > { %s3770_s1 = sld [smem:[#allocation18_spill]]  ;;  %s3774_s15 = smov %s3020_s16 }
 0x197   : > { %s3776_s18 = smov %s3036_s20  ;;  %s3777_s19 = smov %s3040_s21 }
 0x198   : > { %s3773_s14 = smov %s3766_s29  ;;  %21 = sbr.rel (!%p19_p1) target bundleno = 14 (0xe), region = 101 }
 0x199   : > { %s3775_s16 = smov %s3767_s28 }
 0x19b   : > { %s3778_s20 = smov %s3769_s9 }
 0x19c   : > { %s3779_s21 = smov %s3770_s1 }
 0x19d   :  { %1770 = vsyncpa [#allocation3], 1 }
 0x19e   :  { %1772 = vsyncpa [#allocation3 + $0x1], 1 }
 0x19f   :  { %1773 = vsyncpa [#allocation6], 1 }
 0x1a0   :  { %1775 = vsyncpa [#allocation6 + $0x1], 1 }
 0x1a1   :  { %1776 = vsyncpa [#allocation4], 1 }
 0x1a2   :  { %1778 = vsyncpa [#allocation4 + $0x1], 1 }

</bundles_post_ra>
